<compile_context>
chip_gen: v5e
topology: v5e:2x2
jax: 0.10.0
libtpu: 0.0.40
codegen_flags: <defaults>
</compile_context>

<pallas_src>
import functools

import jax
import jax.numpy as jnp
from jax.experimental import pallas as pl
from jax.experimental.pallas import tpu as pltpu

EPS = 1e-5
_VMEM_LIMIT = 32 * 1024 * 1024  # conservative: fits v5e/v6e (128 MiB) and v7x (64 MiB)


# ---------------------------------------------------------------------------
# small helpers
# ---------------------------------------------------------------------------
def _cp(dim_sem):
    return pltpu.CompilerParams(dimension_semantics=dim_sem,
                                vmem_limit_bytes=_VMEM_LIMIT)


def _ce(flops, nbytes):
    return pl.CostEstimate(flops=int(flops), transcendentals=0,
                           bytes_accessed=int(nbytes))


def _full_spec(shape):
    # whole (small) array, same block at every grid step
    return pl.BlockSpec(shape, lambda *args: (0,) * len(shape))


def _bn_param_spec(c):
    return pl.BlockSpec((1, c), lambda *_: (0, 0))


def _partial_stats(y):
    # y: (rows, C) f32  ->  (2, C): [per-channel sum, per-channel sum-of-squares]
    return jnp.concatenate([jnp.sum(y, axis=0, keepdims=True),
                            jnp.sum(y * y, axis=0, keepdims=True)], axis=0)


def _finalize_stats(partial, count):
    # partial: (N, 2, C) per-image partials -> (1, C) mean, (1, C) invstd
    # TODO(synk): E[x^2]-E[x]^2 in f32 is fine for normalized activations but a
    # Welford/two-pass form would be safer for large-magnitude real data.
    c = partial.shape[-1]
    tot = jnp.sum(partial, axis=0)                                 # (2, C)
    mean = tot[0] / count
    var = jnp.maximum(tot[1] / count - mean * mean, 0.0)           # biased var
    invstd = jax.lax.rsqrt(var + EPS)
    return mean.reshape(1, c), invstd.reshape(1, c)


def _bn(y, mean, invstd, gamma, beta):
    return (y - mean) * invstd * gamma + beta


# ---------------------------------------------------------------------------
# kernels
# ---------------------------------------------------------------------------
def _conv1_kernel(x_ref, w1_ref, y1_ref, s1_ref):
    """conv1 (1x1) as a channel matmul (bf16 MXU) + streamed BN1 statistics."""
    th, w, cin = x_ref.shape
    xr = x_ref[...].astype(jnp.bfloat16).reshape(th * w, cin)
    y = jnp.dot(xr, w1_ref[...], preferred_element_type=jnp.float32)
    y1_ref[...] = y.reshape(th, w, -1).astype(y1_ref.dtype)

    @pl.when(pl.program_id(1) == 0)
    def _():
        s1_ref[...] = jnp.zeros_like(s1_ref)
    s1_ref[...] += _partial_stats(y)


def _bn1_conv2_kernel(y1_ref, y1_any, w2_ref, m_ref, v_ref, g_ref, b_ref,
                      y2_ref, s2_ref, halo_ref, sem_ref):
    """bn1 + relu, then 3x3 conv (pad=1) as 9 accumulated bf16 matmuls.

    The current TH-row tile arrives via the pipelined BlockSpec (y1_ref); the
    +/-1 halo rows are fetched with two tiny manual DMAs from the raw HBM view
    (y1_any).  Image-border padding rows/cols are zero *after* bn1+relu.
    """
    n = pl.program_id(0)
    h = pl.program_id(1)
    nh = pl.num_programs(1)
    th, w, p = y1_ref.shape

    # ---- fetch the row halo (zero rows at the image border) ---------------
    @pl.when(h > 0)
    def _():
        cp = pltpu.make_async_copy(y1_any.at[n, pl.ds(h * th - 1, 1)],
                                   halo_ref.at[pl.ds(0, 1)], sem_ref.at[0])
        cp.start()
        cp.wait()

    @pl.when(h == 0)
    def _():
        halo_ref[pl.ds(0, 1)] = jnp.zeros((1, w, p), halo_ref.dtype)

    @pl.when(h < nh - 1)
    def _():
        cp = pltpu.make_async_copy(y1_any.at[n, pl.ds((h + 1) * th, 1)],
                                   halo_ref.at[pl.ds(1, 1)], sem_ref.at[1])
        cp.start()
        cp.wait()

    @pl.when(h == nh - 1)
    def _():
        halo_ref[pl.ds(1, 1)] = jnp.zeros((1, w, p), halo_ref.dtype)

    # ---- bn1 + relu (f32 math, bf16 matmul operands) -----------------------
    mu, inv, ga, be = m_ref[...], v_ref[...], g_ref[...], b_ref[...]

    def bn_relu(v):
        return jnp.maximum(_bn(v.astype(jnp.float32), mu, inv, ga, be),
                           0.0).astype(jnp.bfloat16)

    z_mid = bn_relu(y1_ref[...])                               # (th,   w, p)
    z_hal = bn_relu(halo_ref[...])                             # (2,    w, p)
    zero_row = jnp.zeros((1, w, p), jnp.bfloat16)
    # conv zero-padding must stay zero *after* bn+relu -> mask the border rows
    z_top = jnp.where(h > 0, z_hal[0:1], zero_row)
    z_bot = jnp.where(h < nh - 1, z_hal[1:2], zero_row)
    z = jnp.concatenate([z_top, z_mid, z_bot], axis=0)         # (th+2, w, p)

    # ---- 3x3 conv = 9 accumulated MXU matmuls (no im2col patch buffer) -----
    zero_col = jnp.zeros((th + 2, 1, p), jnp.bfloat16)
    z_l = jnp.concatenate([zero_col, z[:, :w - 1, :]], axis=1)  # input col c-1
    z_r = jnp.concatenate([z[:, 1:, :], zero_col], axis=1)      # input col c+1
    shifted = (z_l, z, z_r)                                     # dx = 0, 1, 2

    acc = jnp.zeros((th * w, p), jnp.float32)
    for dy in range(3):
        for dx in range(3):
            patch = shifted[dx][dy:dy + th].reshape(th * w, p)
            acc = acc + jnp.dot(patch, w2_ref[dy * 3 + dx],
                                preferred_element_type=jnp.float32)

    y2_ref[...] = acc.reshape(th, w, p).astype(y2_ref.dtype)

    # ---- streamed BN2 partial statistics (f32) -----------------------------
    @pl.when(h == 0)
    def _():
        s2_ref[...] = jnp.zeros_like(s2_ref)
    s2_ref[...] += _partial_stats(acc)


def _bn2_conv3_kernel(y2_ref, w3_ref, m_ref, v_ref, g_ref, b_ref,
                      y3_ref, s3_ref):
    """bn2 + relu, then conv3 (1x1) bf16 channel matmul + streamed BN3 stats."""
    th, w, p = y2_ref.shape
    z = _bn(y2_ref[...].astype(jnp.float32).reshape(th * w, p),
            m_ref[...], v_ref[...], g_ref[...], b_ref[...])
    z = jnp.maximum(z, 0.0).astype(jnp.bfloat16)
    y = jnp.dot(z, w3_ref[...], preferred_element_type=jnp.float32)
    y3_ref[...] = y.reshape(th, w, -1).astype(y3_ref.dtype)

    @pl.when(pl.program_id(1) == 0)
    def _():
        s3_ref[...] = jnp.zeros_like(s3_ref)
    s3_ref[...] += _partial_stats(y)


def _bn3_residual_kernel(x_ref, y3_ref, m_ref, v_ref, g_ref, b_ref, o_ref):
    """bn3, residual add (f32 input re-read per tile), final relu."""
    th, w, c4 = y3_ref.shape
    y = _bn(y3_ref[...].astype(jnp.float32).reshape(th * w, c4),
            m_ref[...], v_ref[...], g_ref[...], b_ref[...])
    res = x_ref[...].astype(jnp.float32).reshape(th * w, c4)
    o_ref[...] = jnp.maximum(res + y, 0.0).reshape(th, w, c4).astype(o_ref.dtype)


# ---------------------------------------------------------------------------
# wrapper
# ---------------------------------------------------------------------------
def _pick_row_tile(H, W, C, target_bytes=2 * 1024 * 1024):
    """Largest divisor of H whose (TH, W, C) f32 tile fits the target."""
    best = 1
    for th in range(1, H + 1):
        if H % th == 0 and th * W * C * 4 <= target_bytes:
            best = th
    return best


@functools.partial(jax.jit, static_argnames=("row_tile",))
def bottleneck_forward(x_nchw, params, row_tile=None):
    """x_nchw: (N, Cin, H, W) f32. Returns (N, 4*planes, H, W) f32."""
    x = jnp.transpose(x_nchw, (0, 2, 3, 1)).astype(jnp.float32)   # NHWC
    N, H, W, Cin = x.shape
    P = params["w1"].shape[1]
    C4 = params["w3"].shape[1]
    assert Cin == C4, "no-downsample Bottleneck requires inplanes == planes*4"

    TH = row_tile if row_tile is not None else _pick_row_tile(H, W, Cin)
    assert H % TH == 0, "row_tile must divide H"
    HT = H // TH
    rows = N * H * W
    cnt = float(rows)
    f32, bf16 = jnp.float32, jnp.bfloat16

    # bf16 weights for the MXU
    w1 = params["w1"].astype(bf16)              # (Cin, P)
    w2 = params["w2"].astype(bf16)              # (9, P, P)  [(dy*3+dx), in, out]
    w3 = params["w3"].astype(bf16)              # (P, C4)
    g1, b1 = params["g1"], params["b1"]
    g2, b2 = params["g2"], params["b2"]
    g3, b3 = params["g3"], params["b3"]

    def tile_spec(c):   # (1, TH, W, c) blocks over the (N, HT) grid, batch squeezed
        return pl.BlockSpec((None, TH, W, c), lambda n, h: (n, h, 0, 0))

    def stats_spec(c):  # (2, c) per-image block, VMEM-resident across the HT axis
        return pl.BlockSpec((None, 2, c), lambda n, h: (n, 0, 0))

    # ---- pass 1: conv1 (1x1, bf16) + streamed BN1 stats -------------------
    y1, s1 = pl.pallas_call(
        _conv1_kernel,
        grid=(N, HT),
        in_specs=[tile_spec(Cin), _full_spec(w1.shape)],
        out_specs=(tile_spec(P), stats_spec(P)),
        out_shape=(jax.ShapeDtypeStruct((N, H, W, P), bf16),
                   jax.ShapeDtypeStruct((N, 2, P), f32)),
        compiler_params=_cp(("parallel", "arbitrary")),
        cost_estimate=_ce(2 * rows * Cin * P,
                          4 * x.size + 2 * w1.size + 2 * rows * P + 4 * N * 2 * P),
    )(x, w1)
    m1, v1 = _finalize_stats(s1, cnt)

    # ---- pass 2: bn1+relu -> conv2 (3x3, row-tiled w/ manual row halo) ----
    y2, s2 = pl.pallas_call(
        _bn1_conv2_kernel,
        grid=(N, HT),
        in_specs=[tile_spec(P),
                  pl.BlockSpec(memory_space=pl.ANY),     # raw HBM view for halo rows
                  _full_spec(w2.shape),
                  _bn_param_spec(P), _bn_param_spec(P),
                  _bn_param_spec(P), _bn_param_spec(P)],
        out_specs=(tile_spec(P), stats_spec(P)),
        out_shape=(jax.ShapeDtypeStruct((N, H, W, P), bf16),
                   jax.ShapeDtypeStruct((N, 2, P), f32)),
        scratch_shapes=[pltpu.VMEM((2, W, P), bf16),
                        pltpu.SemaphoreType.DMA((2,))],
        compiler_params=_cp(("parallel", "arbitrary")),
        cost_estimate=_ce(2 * rows * 9 * P * P,
                          2 * (2 * rows * P) + 2 * w2.size + 4 * N * 2 * P),
    )(y1, y1, w2, m1, v1, g1, b1)
    m2, v2 = _finalize_stats(s2, cnt)

    # ---- pass 3: bn2+relu -> conv3 (1x1, bf16) + streamed BN3 stats -------
    y3, s3 = pl.pallas_call(
        _bn2_conv3_kernel,
        grid=(N, HT),
        in_specs=[tile_spec(P), _full_spec(w3.shape),
                  _bn_param_spec(P), _bn_param_spec(P),
                  _bn_param_spec(P), _bn_param_spec(P)],
        out_specs=(tile_spec(C4), stats_spec(C4)),
        out_shape=(jax.ShapeDtypeStruct((N, H, W, C4), bf16),
                   jax.ShapeDtypeStruct((N, 2, C4), f32)),
        compiler_params=_cp(("parallel", "arbitrary")),
        cost_estimate=_ce(2 * rows * P * C4,
                          2 * rows * P + 2 * w3.size + 2 * rows * C4 + 4 * N * 2 * C4),
    )(y2, w3, m2, v2, g2, b2)
    m3, v3 = _finalize_stats(s3, cnt)

    # ---- pass 4: bn3 + residual add + relu --------------------------------
    out = pl.pallas_call(
        _bn3_residual_kernel,
        grid=(N, HT),
        in_specs=[tile_spec(Cin), tile_spec(C4),
                  _bn_param_spec(C4), _bn_param_spec(C4),
                  _bn_param_spec(C4), _bn_param_spec(C4)],
        out_specs=tile_spec(C4),
        out_shape=jax.ShapeDtypeStruct((N, H, W, C4), f32),
        compiler_params=_cp(("parallel", "parallel")),
        cost_estimate=_ce(5 * rows * C4, 4 * rows * C4 + 2 * rows * C4 + 4 * rows * C4),
    )(x, y3, m3, v3, g3, b3)

    return jnp.transpose(out, (0, 3, 1, 2))   # NHWC -> NCHW


# ---------------------------------------------------------------------------
# parameters & pure-JAX reference
# ---------------------------------------------------------------------------
def make_params(key, inplanes, planes):
    """Deterministic synthetic parameters with the nn.Module's conv shapes,
    pre-transformed into the kernel's lane-dense layouts (f32 master copies)."""
    ks = jax.random.split(key, 9)
    p4 = planes * 4
    # PyTorch conv weight shapes: (out, in, kh, kw)
    w1_t = jax.random.normal(ks[0], (planes, inplanes, 1, 1), jnp.float32) * 0.1
    w2_t = jax.random.normal(ks[1], (planes, planes, 3, 3), jnp.float32) * 0.1
    w3_t = jax.random.normal(ks[2], (p4, planes, 1, 1), jnp.float32) * 0.1
    return {
        # 1x1 convs -> (in, out) matmul weights
        "w1": jnp.transpose(w1_t[:, :, 0, 0], (1, 0)),                  # (Cin, P)
        "w3": jnp.transpose(w3_t[:, :, 0, 0], (1, 0)),                  # (P, 4P)
        # 3x3 conv -> (9, in, out) stacked per-tap weights, (dy, dx) row-major
        "w2": jnp.transpose(w2_t, (2, 3, 1, 0)).reshape(9, planes, planes),
        # BN affine params, 2D (1, C) for lane-friendly broadcast
        "g1": (1.0 + 0.1 * jax.random.normal(ks[3], (1, planes))).astype(jnp.float32),
        "b1": (0.1 * jax.random.normal(ks[4], (1, planes))).astype(jnp.float32),
        "g2": (1.0 + 0.1 * jax.random.normal(ks[5], (1, planes))).astype(jnp.float32),
        "b2": (0.1 * jax.random.normal(ks[6], (1, planes))).astype(jnp.float32),
        "g3": (1.0 + 0.1 * jax.random.normal(ks[7], (1, p4))).astype(jnp.float32),
        "b3": (0.1 * jax.random.normal(ks[8], (1, p4))).astype(jnp.float32),
    }


def reference_forward(x_nchw, params):
    """Pure-f32 XLA reference with the module's math, for validation."""
    x = jnp.transpose(x_nchw, (0, 2, 3, 1)).astype(jnp.float32)
    Cin = x.shape[-1]
    P = params["w1"].shape[1]
    C4 = params["w3"].shape[1]

    def conv(y, w_hwio, pad):
        return jax.lax.conv_general_dilated(
            y, w_hwio, window_strides=(1, 1), padding=pad,
            dimension_numbers=("NHWC", "HWIO", "NHWC"),
            precision=jax.lax.Precision.HIGHEST)

    def bn(y, g, b):
        mean = jnp.mean(y, axis=(0, 1, 2), keepdims=True)
        var = jnp.mean((y - mean) ** 2, axis=(0, 1, 2), keepdims=True)
        return (y - mean) * jax.lax.rsqrt(var + EPS) * g.reshape(1, 1, 1, -1) \
            + b.reshape(1, 1, 1, -1)

    w1 = params["w1"].reshape(1, 1, Cin, P)
    w2 = params["w2"].reshape(3, 3, P, P)        # HWIO
    w3 = params["w3"].reshape(1, 1, P, C4)

    y = jax.nn.relu(bn(conv(x, w1, "VALID"), params["g1"], params["b1"]))
    y = jax.nn.relu(bn(conv(y, w2, "SAME"), params["g2"], params["b2"]))
    y = bn(conv(y, w3, "VALID"), params["g3"], params["b3"])
    out = jax.nn.relu(x + y)
    return jnp.transpose(out, (0, 3, 1, 2))


if __name__ == "__main__":
    # Bottleneck(inplanes=64, planes=16), stride=1, downsample=None
    #   x: (N=2, C=64, H=16, W=16) -> out: (2, 64, 16, 16)
    inplanes, planes = 64, 16
    N, H, W = 2, 16, 16

    key = jax.random.PRNGKey(0)
    kx, kp = jax.random.split(key)
    x = jax.random.normal(kx, (N, inplanes, H, W), jnp.float32)
    params = make_params(kp, inplanes, planes)

    # row_tile=4 -> grid (N=2, HT=4): exercises the row-halo DMA path and the
    # streamed (accumulated) BN statistics across multiple row tiles.
    out = bottleneck_forward(x, params, row_tile=4)
    out = jax.block_until_ready(out)

    ref = jax.block_until_ready(reference_forward(x, params))
    assert out.shape == (N, planes * 4, H, W)
    err_max = float(jnp.max(jnp.abs(out - ref)))
    err_mean = float(jnp.mean(jnp.abs(out - ref)))
    # bf16 matmul operands / bf16 intermediates vs. the f32 reference: allow a
    # loose absolute bound but require a tight mean error (catches any
    # structural/halo/BN bug, which would be O(0.1-1) over many pixels).
    assert err_max < 0.15 and err_mean < 0.02, (err_max, err_mean)

    print("KERNEL_OK")
</pallas_src>

<mosaic_0001>
module attributes {stable_mosaic.version = 11 : i64} {
  func.func @_conv1_kernel(%arg0: i32, %arg1: i32, %arg2: memref<1x4x16x64xf32, #tpu.memory_space<vmem>>, %arg3: memref<64x16xbf16, #tpu.memory_space<vmem>>, %arg4: memref<1x4x16x16xbf16, #tpu.memory_space<vmem>>, %arg5: memref<1x2x16xf32, #tpu.memory_space<vmem>>) attributes {dimension_semantics = [#tpu.dimension_semantics<parallel>, #tpu.dimension_semantics<arbitrary>], iteration_bounds = array<i64: 2, 4>, scalar_prefetch = 0 : i64, scratch_operands = 0 : i64, tpu.core_type = #tpu.core_type<tc>, window_params = [{transform_indices = @transform_0, window_bounds = array<i64: 1, 4, 16, 64>}, {pipeline_mode = #tpu.pipeline_mode<synchronous>, transform_indices = @transform_1, window_bounds = array<i64: 64, 16>}, {transform_indices = @transform_2, window_bounds = array<i64: 1, 4, 16, 16>}, {transform_indices = @transform_3, window_bounds = array<i64: 1, 2, 16>}]} {
    %c0 = arith.constant 0 : index
    %c0_0 = arith.constant 0 : index
    %c0_1 = arith.constant 0 : index
    %c0_2 = arith.constant 0 : index
    %0 = vector.load %arg2[%c0, %c0_0, %c0_1, %c0_2] : memref<1x4x16x64xf32, #tpu.memory_space<vmem>>, vector<1x4x16x64xf32>
    %1 = vector.shape_cast %0 : vector<1x4x16x64xf32> to vector<4x16x64xf32>
    %2 = arith.truncf %1 : vector<4x16x64xf32> to vector<4x16x64xbf16>
    %3 = vector.shape_cast %2 : vector<4x16x64xbf16> to vector<64x64xbf16>
    %c0_3 = arith.constant 0 : index
    %c0_4 = arith.constant 0 : index
    %4 = vector.load %arg3[%c0_3, %c0_4] : memref<64x16xbf16, #tpu.memory_space<vmem>>, vector<64x16xbf16>
    %cst = arith.constant dense<0.000000e+00> : vector<64x16xf32>
    %5 = tpu.matmul %3, %4, %cst {dimension_numbers = #tpu.dot_dimension_numbers<[1], [0], [0], [1], [0, 0, 1, 1], [], []>} : vector<64x64xbf16>, vector<64x16xbf16>, vector<64x16xf32> -> vector<64x16xf32>
    %6 = vector.shape_cast %5 : vector<64x16xf32> to vector<4x16x16xf32>
    %7 = arith.truncf %6 : vector<4x16x16xf32> to vector<4x16x16xbf16>
    %c0_5 = arith.constant 0 : index
    %c0_6 = arith.constant 0 : index
    %c0_7 = arith.constant 0 : index
    %c0_8 = arith.constant 0 : index
    %8 = vector.load %arg4[%c0_5, %c0_6, %c0_7, %c0_8] : memref<1x4x16x16xbf16, #tpu.memory_space<vmem>>, vector<1x4x16x16xbf16>
    %9 = vector.shape_cast %8 : vector<1x4x16x16xbf16> to vector<4x16x16xbf16>
    %10 = vector.shape_cast %7 : vector<4x16x16xbf16> to vector<1x4x16x16xbf16>
    tpu.vector_store %arg4[%c0_5, %c0_6, %c0_7, %c0_8], %10 {strides = array<i32>} : memref<1x4x16x16xbf16, #tpu.memory_space<vmem>>, vector<1x4x16x16xbf16>,
    %c0_i32 = arith.constant 0 : i32
    %11 = arith.cmpi eq, %arg1, %c0_i32 : i32
    %12 = arith.extui %11 : i1 to i32
    %c0_i32_9 = arith.constant 0 : i32
    %13 = arith.cmpi ne, %12, %c0_i32_9 : i32
    scf.if %13 {
      %cst_18 = arith.constant 0.000000e+00 : f32
      %26 = vector.broadcast %cst_18 : f32 to vector<2x16xf32>
      %c0_19 = arith.constant 0 : index
      %c0_20 = arith.constant 0 : index
      %c0_21 = arith.constant 0 : index
      %27 = vector.load %arg5[%c0_19, %c0_20, %c0_21] : memref<1x2x16xf32, #tpu.memory_space<vmem>>, vector<1x2x16xf32>
      %28 = vector.shape_cast %27 : vector<1x2x16xf32> to vector<2x16xf32>
      %29 = vector.shape_cast %26 : vector<2x16xf32> to vector<1x2x16xf32>
      tpu.vector_store %arg5[%c0_19, %c0_20, %c0_21], %29 {strides = array<i32>} : memref<1x2x16xf32, #tpu.memory_space<vmem>>, vector<1x2x16xf32>,
    } else {
    }
    %c0_10 = arith.constant 0 : index
    %c0_11 = arith.constant 0 : index
    %c0_12 = arith.constant 0 : index
    %14 = vector.load %arg5[%c0_10, %c0_11, %c0_12] : memref<1x2x16xf32, #tpu.memory_space<vmem>>, vector<1x2x16xf32>
    %15 = vector.shape_cast %14 : vector<1x2x16xf32> to vector<2x16xf32>
    %cst_13 = arith.constant dense<0.000000e+00> : vector<16xf32>
    %16 = vector.multi_reduction <add>, %5, %cst_13 [0] : vector<64x16xf32> to vector<16xf32>
    %17 = vector.shape_cast %16 : vector<16xf32> to vector<1x16xf32>
    %18 = arith.mulf %5, %5 : vector<64x16xf32>
    %cst_14 = arith.constant dense<0.000000e+00> : vector<16xf32>
    %19 = vector.multi_reduction <add>, %18, %cst_14 [0] : vector<64x16xf32> to vector<16xf32>
    %20 = vector.shape_cast %19 : vector<16xf32> to vector<1x16xf32>
    %21 = tpu.concatenate %17, %20 in 0 : vector<1x16xf32>, vector<1x16xf32> -> vector<2x16xf32>
    %22 = arith.addf %15, %21 : vector<2x16xf32>
    %c0_15 = arith.constant 0 : index
    %c0_16 = arith.constant 0 : index
    %c0_17 = arith.constant 0 : index
    %23 = vector.load %arg5[%c0_15, %c0_16, %c0_17] : memref<1x2x16xf32, #tpu.memory_space<vmem>>, vector<1x2x16xf32>
    %24 = vector.shape_cast %23 : vector<1x2x16xf32> to vector<2x16xf32>
    %25 = vector.shape_cast %22 : vector<2x16xf32> to vector<1x2x16xf32>
    tpu.vector_store %arg5[%c0_15, %c0_16, %c0_17], %25 {strides = array<i32>} : memref<1x2x16xf32, #tpu.memory_space<vmem>>, vector<1x2x16xf32>,
    return
  }
  func.func @transform_0(%arg0: i32, %arg1: i32) -> (i32, i32, i32, i32) {
    %c0_i32 = arith.constant 0 : i32
    %c0_i32_0 = arith.constant 0 : i32
    %c0_i32_1 = arith.constant 0 : i32
    return %arg0, %arg1, %c0_i32, %c0_i32_0 : i32, i32, i32, i32
  }
  func.func @transform_1(%arg0: i32, %arg1: i32) -> (i32, i32) {
    %c0_i32 = arith.constant 0 : i32
    %c0_i32_0 = arith.constant 0 : i32
    %c0_i32_1 = arith.constant 0 : i32
    return %c0_i32, %c0_i32_0 : i32, i32
  }
  func.func @transform_2(%arg0: i32, %arg1: i32) -> (i32, i32, i32, i32) {
    %c0_i32 = arith.constant 0 : i32
    %c0_i32_0 = arith.constant 0 : i32
    %c0_i32_1 = arith.constant 0 : i32
    return %arg0, %arg1, %c0_i32, %c0_i32_0 : i32, i32, i32, i32
  }
  func.func @transform_3(%arg0: i32, %arg1: i32) -> (i32, i32, i32) {
    %c0_i32 = arith.constant 0 : i32
    %c0_i32_0 = arith.constant 0 : i32
    %c0_i32_1 = arith.constant 0 : i32
    return %arg0, %c0_i32, %c0_i32_0 : i32, i32, i32
  }
}

module attributes {stable_mosaic.version = 11 : i64} {
  func.func @_bn1_conv2_kernel(%arg0: i32, %arg1: i32, %arg2: memref<1x4x16x16xbf16, #tpu.memory_space<vmem>>, %arg3: memref<2x16x16x16xbf16, #tpu.memory_space<any>>, %arg4: memref<9x16x16xbf16, #tpu.memory_space<vmem>>, %arg5: memref<1x16xf32, #tpu.memory_space<vmem>>, %arg6: memref<1x16xf32, #tpu.memory_space<vmem>>, %arg7: memref<1x16xf32, #tpu.memory_space<vmem>>, %arg8: memref<1x16xf32, #tpu.memory_space<vmem>>, %arg9: memref<1x4x16x16xbf16, #tpu.memory_space<vmem>>, %arg10: memref<1x2x16xf32, #tpu.memory_space<vmem>>, %arg11: memref<2x16x16xbf16, #tpu.memory_space<vmem>>, %arg12: memref<2x!tpu.dma_semaphore, #tpu.memory_space<semaphore_mem>>) attributes {dimension_semantics = [#tpu.dimension_semantics<parallel>, #tpu.dimension_semantics<arbitrary>], iteration_bounds = array<i64: 2, 4>, scalar_prefetch = 0 : i64, scratch_operands = 2 : i64, tpu.core_type = #tpu.core_type<tc>, window_params = [{transform_indices = @transform_0, window_bounds = array<i64: 1, 4, 16, 16>}, {}, {pipeline_mode = #tpu.pipeline_mode<synchronous>, transform_indices = @transform_2, window_bounds = array<i64: 9, 16, 16>}, {pipeline_mode = #tpu.pipeline_mode<synchronous>, transform_indices = @transform_3, window_bounds = array<i64: 1, 16>}, {pipeline_mode = #tpu.pipeline_mode<synchronous>, transform_indices = @transform_4, window_bounds = array<i64: 1, 16>}, {pipeline_mode = #tpu.pipeline_mode<synchronous>, transform_indices = @transform_5, window_bounds = array<i64: 1, 16>}, {pipeline_mode = #tpu.pipeline_mode<synchronous>, transform_indices = @transform_6, window_bounds = array<i64: 1, 16>}, {transform_indices = @transform_7, window_bounds = array<i64: 1, 4, 16, 16>}, {transform_indices = @transform_8, window_bounds = array<i64: 1, 2, 16>}]} {
    %c0_i32 = arith.constant 0 : i32
    %0 = arith.cmpi sgt, %arg1, %c0_i32 : i32
    %1 = arith.extui %0 : i1 to i32
    %c0_i32_0 = arith.constant 0 : i32
    %2 = arith.cmpi ne, %1, %c0_i32_0 : i32
    scf.if %2 {
      %c4_i32 = arith.constant 4 : i32
      %139 = arith.muli %arg1, %c4_i32 : i32
      %c1_i32 = arith.constant 1 : i32
      %140 = arith.subi %139, %c1_i32 : i32
      %c0_i32_68 = arith.constant 0 : i32
      %c0_i32_69 = arith.constant 0 : i32
      %c0_i32_70 = arith.constant 0 : i32
      %141 = tpu.memref_slice %arg3[%arg0, %140, %c0_i32_69, %c0_i32_70] : memref<2x16x16x16xbf16, #tpu.memory_space<any>> -> memref<1x1x16x16xbf16, #tpu.memory_space<any>>
      %142 = tpu.memref_squeeze %141 : memref<1x1x16x16xbf16, #tpu.memory_space<any>> -> memref<1x16x16xbf16, #tpu.memory_space<any>>
      %c0_i32_71 = arith.constant 0 : i32
      %c0_i32_72 = arith.constant 0 : i32
      %c0_i32_73 = arith.constant 0 : i32
      %143 = tpu.memref_slice %arg11[%c0_i32_71, %c0_i32_72, %c0_i32_73] : memref<2x16x16xbf16, #tpu.memory_space<vmem>> -> memref<1x16x16xbf16, #tpu.memory_space<vmem>>
      %144 = tpu.memref_slice %arg12[%c0_i32_68] : memref<2x!tpu.dma_semaphore, #tpu.memory_space<semaphore_mem>> -> memref<1x!tpu.dma_semaphore, #tpu.memory_space<semaphore_mem>>
      %145 = tpu.memref_squeeze %144 : memref<1x!tpu.dma_semaphore, #tpu.memory_space<semaphore_mem>> -> memref<!tpu.dma_semaphore, #tpu.memory_space<semaphore_mem>>
      tpu.enqueue_dma source(%142 : memref<1x16x16xbf16, #tpu.memory_space<any>>) target(%143 : memref<1x16x16xbf16, #tpu.memory_space<vmem>>) target_semaphore(%145 : memref<!tpu.dma_semaphore, #tpu.memory_space<semaphore_mem>>)
      %c0_i32_74 = arith.constant 0 : i32
      %c0_i32_75 = arith.constant 0 : i32
      %c0_i32_76 = arith.constant 0 : i32
      %146 = tpu.memref_slice %arg3[%arg0, %140, %c0_i32_75, %c0_i32_76] : memref<2x16x16x16xbf16, #tpu.memory_space<any>> -> memref<1x1x16x16xbf16, #tpu.memory_space<any>>
      %147 = tpu.memref_squeeze %146 : memref<1x1x16x16xbf16, #tpu.memory_space<any>> -> memref<1x16x16xbf16, #tpu.memory_space<any>>
      %c0_i32_77 = arith.constant 0 : i32
      %c0_i32_78 = arith.constant 0 : i32
      %c0_i32_79 = arith.constant 0 : i32
      %148 = tpu.memref_slice %arg11[%c0_i32_77, %c0_i32_78, %c0_i32_79] : memref<2x16x16xbf16, #tpu.memory_space<vmem>> -> memref<1x16x16xbf16, #tpu.memory_space<vmem>>
      %149 = tpu.memref_slice %arg12[%c0_i32_74] : memref<2x!tpu.dma_semaphore, #tpu.memory_space<semaphore_mem>> -> memref<1x!tpu.dma_semaphore, #tpu.memory_space<semaphore_mem>>
      %150 = tpu.memref_squeeze %149 : memref<1x!tpu.dma_semaphore, #tpu.memory_space<semaphore_mem>> -> memref<!tpu.dma_semaphore, #tpu.memory_space<semaphore_mem>>
      tpu.wait_dma2 semaphore(%150 : memref<!tpu.dma_semaphore, #tpu.memory_space<semaphore_mem>>) src(%147 : memref<1x16x16xbf16, #tpu.memory_space<any>>) dst(%148 : memref<1x16x16xbf16, #tpu.memory_space<vmem>>)
    } else {
    }
    %c0_i32_1 = arith.constant 0 : i32
    %3 = arith.cmpi eq, %arg1, %c0_i32_1 : i32
    %4 = arith.extui %3 : i1 to i32
    %c0_i32_2 = arith.constant 0 : i32
    %5 = arith.cmpi ne, %4, %c0_i32_2 : i32
    scf.if %5 {
      %cst_68 = arith.constant 0.000000e+00 : bf16
      %139 = vector.broadcast %cst_68 : bf16 to vector<1x16x16xbf16>
      %c0_69 = arith.constant 0 : index
      %c0_70 = arith.constant 0 : index
      %c0_71 = arith.constant 0 : index
      %140 = vector.load %arg11[%c0_69, %c0_70, %c0_71] : memref<2x16x16xbf16, #tpu.memory_space<vmem>>, vector<1x16x16xbf16>
      tpu.vector_store %arg11[%c0_69, %c0_70, %c0_71], %139 {strides = array<i32>} : memref<2x16x16xbf16, #tpu.memory_space<vmem>>, vector<1x16x16xbf16>,
    } else {
    }
    %c3_i32 = arith.constant 3 : i32
    %6 = arith.cmpi slt, %arg1, %c3_i32 : i32
    %7 = arith.extui %6 : i1 to i32
    %c0_i32_3 = arith.constant 0 : i32
    %8 = arith.cmpi ne, %7, %c0_i32_3 : i32
    scf.if %8 {
      %c1_i32 = arith.constant 1 : i32
      %139 = arith.addi %arg1, %c1_i32 : i32
      %c4_i32 = arith.constant 4 : i32
      %140 = arith.muli %139, %c4_i32 : i32
      %c1_i32_68 = arith.constant 1 : i32
      %c0_i32_69 = arith.constant 0 : i32
      %c0_i32_70 = arith.constant 0 : i32
      %141 = tpu.memref_slice %arg3[%arg0, %140, %c0_i32_69, %c0_i32_70] : memref<2x16x16x16xbf16, #tpu.memory_space<any>> -> memref<1x1x16x16xbf16, #tpu.memory_space<any>>
      %142 = tpu.memref_squeeze %141 : memref<1x1x16x16xbf16, #tpu.memory_space<any>> -> memref<1x16x16xbf16, #tpu.memory_space<any>>
      %c1_i32_71 = arith.constant 1 : i32
      %c0_i32_72 = arith.constant 0 : i32
      %c0_i32_73 = arith.constant 0 : i32
      %143 = tpu.memref_slice %arg11[%c1_i32_71, %c0_i32_72, %c0_i32_73] : memref<2x16x16xbf16, #tpu.memory_space<vmem>> -> memref<1x16x16xbf16, #tpu.memory_space<vmem>>
      %144 = tpu.memref_slice %arg12[%c1_i32_68] : memref<2x!tpu.dma_semaphore, #tpu.memory_space<semaphore_mem>> -> memref<1x!tpu.dma_semaphore, #tpu.memory_space<semaphore_mem>>
      %145 = tpu.memref_squeeze %144 : memref<1x!tpu.dma_semaphore, #tpu.memory_space<semaphore_mem>> -> memref<!tpu.dma_semaphore, #tpu.memory_space<semaphore_mem>>
      tpu.enqueue_dma source(%142 : memref<1x16x16xbf16, #tpu.memory_space<any>>) target(%143 : memref<1x16x16xbf16, #tpu.memory_space<vmem>>) target_semaphore(%145 : memref<!tpu.dma_semaphore, #tpu.memory_space<semaphore_mem>>)
      %c1_i32_74 = arith.constant 1 : i32
      %c0_i32_75 = arith.constant 0 : i32
      %c0_i32_76 = arith.constant 0 : i32
      %146 = tpu.memref_slice %arg3[%arg0, %140, %c0_i32_75, %c0_i32_76] : memref<2x16x16x16xbf16, #tpu.memory_space<any>> -> memref<1x1x16x16xbf16, #tpu.memory_space<any>>
      %147 = tpu.memref_squeeze %146 : memref<1x1x16x16xbf16, #tpu.memory_space<any>> -> memref<1x16x16xbf16, #tpu.memory_space<any>>
      %c1_i32_77 = arith.constant 1 : i32
      %c0_i32_78 = arith.constant 0 : i32
      %c0_i32_79 = arith.constant 0 : i32
      %148 = tpu.memref_slice %arg11[%c1_i32_77, %c0_i32_78, %c0_i32_79] : memref<2x16x16xbf16, #tpu.memory_space<vmem>> -> memref<1x16x16xbf16, #tpu.memory_space<vmem>>
      %149 = tpu.memref_slice %arg12[%c1_i32_74] : memref<2x!tpu.dma_semaphore, #tpu.memory_space<semaphore_mem>> -> memref<1x!tpu.dma_semaphore, #tpu.memory_space<semaphore_mem>>
      %150 = tpu.memref_squeeze %149 : memref<1x!tpu.dma_semaphore, #tpu.memory_space<semaphore_mem>> -> memref<!tpu.dma_semaphore, #tpu.memory_space<semaphore_mem>>
      tpu.wait_dma2 semaphore(%150 : memref<!tpu.dma_semaphore, #tpu.memory_space<semaphore_mem>>) src(%147 : memref<1x16x16xbf16, #tpu.memory_space<any>>) dst(%148 : memref<1x16x16xbf16, #tpu.memory_space<vmem>>)
    } else {
    }
    %c3_i32_4 = arith.constant 3 : i32
    %9 = arith.cmpi eq, %arg1, %c3_i32_4 : i32
    %10 = arith.extui %9 : i1 to i32
    %c0_i32_5 = arith.constant 0 : i32
    %11 = arith.cmpi ne, %10, %c0_i32_5 : i32
    scf.if %11 {
      %cst_68 = arith.constant 0.000000e+00 : bf16
      %139 = vector.broadcast %cst_68 : bf16 to vector<1x16x16xbf16>
      %c1_69 = arith.constant 1 : index
      %c0_70 = arith.constant 0 : index
      %c0_71 = arith.constant 0 : index
      %140 = vector.load %arg11[%c1_69, %c0_70, %c0_71] : memref<2x16x16xbf16, #tpu.memory_space<vmem>>, vector<1x16x16xbf16>
      tpu.vector_store %arg11[%c1_69, %c0_70, %c0_71], %139 {strides = array<i32>} : memref<2x16x16xbf16, #tpu.memory_space<vmem>>, vector<1x16x16xbf16>,
    } else {
    }
    %c0 = arith.constant 0 : index
    %c0_6 = arith.constant 0 : index
    %12 = vector.load %arg5[%c0, %c0_6] : memref<1x16xf32, #tpu.memory_space<vmem>>, vector<1x16xf32>
    %c0_7 = arith.constant 0 : index
    %c0_8 = arith.constant 0 : index
    %13 = vector.load %arg6[%c0_7, %c0_8] : memref<1x16xf32, #tpu.memory_space<vmem>>, vector<1x16xf32>
    %c0_9 = arith.constant 0 : index
    %c0_10 = arith.constant 0 : index
    %14 = vector.load %arg7[%c0_9, %c0_10] : memref<1x16xf32, #tpu.memory_space<vmem>>, vector<1x16xf32>
    %c0_11 = arith.constant 0 : index
    %c0_12 = arith.constant 0 : index
    %15 = vector.load %arg8[%c0_11, %c0_12] : memref<1x16xf32, #tpu.memory_space<vmem>>, vector<1x16xf32>
    %c0_13 = arith.constant 0 : index
    %c0_14 = arith.constant 0 : index
    %c0_15 = arith.constant 0 : index
    %c0_16 = arith.constant 0 : index
    %16 = vector.load %arg2[%c0_13, %c0_14, %c0_15, %c0_16] : memref<1x4x16x16xbf16, #tpu.memory_space<vmem>>, vector<1x4x16x16xbf16>
    %17 = vector.shape_cast %16 : vector<1x4x16x16xbf16> to vector<4x16x16xbf16>
    %18 = arith.extf %17 : vector<4x16x16xbf16> to vector<4x16x16xf32>
    %19 = vector.shape_cast %12 : vector<1x16xf32> to vector<1x1x16xf32>
    %20 = vector.broadcast %19 : vector<1x1x16xf32> to vector<4x16x16xf32>
    %21 = arith.subf %18, %20 : vector<4x16x16xf32>
    %22 = vector.shape_cast %13 : vector<1x16xf32> to vector<1x1x16xf32>
    %23 = vector.broadcast %22 : vector<1x1x16xf32> to vector<4x16x16xf32>
    %24 = arith.mulf %21, %23 : vector<4x16x16xf32>
    %25 = vector.shape_cast %14 : vector<1x16xf32> to vector<1x1x16xf32>
    %26 = vector.broadcast %25 : vector<1x1x16xf32> to vector<4x16x16xf32>
    %27 = arith.mulf %24, %26 : vector<4x16x16xf32>
    %28 = vector.shape_cast %15 : vector<1x16xf32> to vector<1x1x16xf32>
    %29 = vector.broadcast %28 : vector<1x1x16xf32> to vector<4x16x16xf32>
    %30 = arith.addf %27, %29 : vector<4x16x16xf32>
    %cst = arith.constant 0.000000e+00 : f32
    %31 = vector.broadcast %cst : f32 to vector<4x16x16xf32>
    %32 = arith.maximumf %30, %31 : vector<4x16x16xf32>
    %33 = arith.truncf %32 : vector<4x16x16xf32> to vector<4x16x16xbf16>
    %c0_17 = arith.constant 0 : index
    %c0_18 = arith.constant 0 : index
    %c0_19 = arith.constant 0 : index
    %34 = vector.load %arg11[%c0_17, %c0_18, %c0_19] : memref<2x16x16xbf16, #tpu.memory_space<vmem>>, vector<2x16x16xbf16>
    %35 = arith.extf %34 : vector<2x16x16xbf16> to vector<2x16x16xf32>
    %36 = vector.shape_cast %12 : vector<1x16xf32> to vector<1x1x16xf32>
    %37 = vector.broadcast %36 : vector<1x1x16xf32> to vector<2x16x16xf32>
    %38 = arith.subf %35, %37 : vector<2x16x16xf32>
    %39 = vector.shape_cast %13 : vector<1x16xf32> to vector<1x1x16xf32>
    %40 = vector.broadcast %39 : vector<1x1x16xf32> to vector<2x16x16xf32>
    %41 = arith.mulf %38, %40 : vector<2x16x16xf32>
    %42 = vector.shape_cast %14 : vector<1x16xf32> to vector<1x1x16xf32>
    %43 = vector.broadcast %42 : vector<1x1x16xf32> to vector<2x16x16xf32>
    %44 = arith.mulf %41, %43 : vector<2x16x16xf32>
    %45 = vector.shape_cast %15 : vector<1x16xf32> to vector<1x1x16xf32>
    %46 = vector.broadcast %45 : vector<1x1x16xf32> to vector<2x16x16xf32>
    %47 = arith.addf %44, %46 : vector<2x16x16xf32>
    %cst_20 = arith.constant 0.000000e+00 : f32
    %48 = vector.broadcast %cst_20 : f32 to vector<2x16x16xf32>
    %49 = arith.maximumf %47, %48 : vector<2x16x16xf32>
    %50 = arith.truncf %49 : vector<2x16x16xf32> to vector<2x16x16xbf16>
    %cst_21 = arith.constant 0.000000e+00 : bf16
    %51 = vector.broadcast %cst_21 : bf16 to vector<1x16x16xbf16>
    %c0_i32_22 = arith.constant 0 : i32
    %52 = arith.cmpi sgt, %arg1, %c0_i32_22 : i32
    %53 = vector.extract_strided_slice %50 {offsets = [0, 0, 0], sizes = [1, 16, 16], strides = [1, 1, 1]} : vector<2x16x16xbf16> to vector<1x16x16xbf16>
    %54 = arith.select %52, %53, %51 : vector<1x16x16xbf16>
    %c3_i32_23 = arith.constant 3 : i32
    %55 = arith.cmpi slt, %arg1, %c3_i32_23 : i32
    %56 = vector.extract_strided_slice %50 {offsets = [1, 0, 0], sizes = [1, 16, 16], strides = [1, 1, 1]} : vector<2x16x16xbf16> to vector<1x16x16xbf16>
    %57 = arith.select %55, %56, %51 : vector<1x16x16xbf16>
    %58 = tpu.concatenate %54, %33, %57 in 0 : vector<1x16x16xbf16>, vector<4x16x16xbf16>, vector<1x16x16xbf16> -> vector<6x16x16xbf16>
    %cst_24 = arith.constant 0.000000e+00 : bf16
    %59 = vector.broadcast %cst_24 : bf16 to vector<6x1x16xbf16>
    %60 = vector.extract_strided_slice %58 {offsets = [0, 0, 0], sizes = [6, 15, 16], strides = [1, 1, 1]} : vector<6x16x16xbf16> to vector<6x15x16xbf16>
    %61 = tpu.concatenate %59, %60 in 1 : vector<6x1x16xbf16>, vector<6x15x16xbf16> -> vector<6x16x16xbf16>
    %62 = vector.extract_strided_slice %58 {offsets = [0, 1, 0], sizes = [6, 15, 16], strides = [1, 1, 1]} : vector<6x16x16xbf16> to vector<6x15x16xbf16>
    %63 = tpu.concatenate %62, %59 in 1 : vector<6x15x16xbf16>, vector<6x1x16xbf16> -> vector<6x16x16xbf16>
    %cst_25 = arith.constant 0.000000e+00 : f32
    %64 = vector.broadcast %cst_25 : f32 to vector<64x16xf32>
    %65 = vector.extract_strided_slice %61 {offsets = [0, 0, 0], sizes = [4, 16, 16], strides = [1, 1, 1]} : vector<6x16x16xbf16> to vector<4x16x16xbf16>
    %66 = vector.shape_cast %65 : vector<4x16x16xbf16> to vector<64x16xbf16>
    %c0_26 = arith.constant 0 : index
    %c0_27 = arith.constant 0 : index
    %c0_28 = arith.constant 0 : index
    %67 = vector.load %arg4[%c0_26, %c0_27, %c0_28] : memref<9x16x16xbf16, #tpu.memory_space<vmem>>, vector<1x16x16xbf16>
    %68 = vector.shape_cast %67 : vector<1x16x16xbf16> to vector<16x16xbf16>
    %cst_29 = arith.constant dense<0.000000e+00> : vector<64x16xf32>
    %69 = tpu.matmul %66, %68, %cst_29 {dimension_numbers = #tpu.dot_dimension_numbers<[1], [0], [0], [1], [0, 0, 1, 1], [], []>} : vector<64x16xbf16>, vector<16x16xbf16>, vector<64x16xf32> -> vector<64x16xf32>
    %70 = arith.addf %64, %69 : vector<64x16xf32>
    %71 = vector.extract_strided_slice %58 {offsets = [0, 0, 0], sizes = [4, 16, 16], strides = [1, 1, 1]} : vector<6x16x16xbf16> to vector<4x16x16xbf16>
    %72 = vector.shape_cast %71 : vector<4x16x16xbf16> to vector<64x16xbf16>
    %c1 = arith.constant 1 : index
    %c0_30 = arith.constant 0 : index
    %c0_31 = arith.constant 0 : index
    %73 = vector.load %arg4[%c1, %c0_30, %c0_31] : memref<9x16x16xbf16, #tpu.memory_space<vmem>>, vector<1x16x16xbf16>
    %74 = vector.shape_cast %73 : vector<1x16x16xbf16> to vector<16x16xbf16>
    %cst_32 = arith.constant dense<0.000000e+00> : vector<64x16xf32>
    %75 = tpu.matmul %72, %74, %cst_32 {dimension_numbers = #tpu.dot_dimension_numbers<[1], [0], [0], [1], [0, 0, 1, 1], [], []>} : vector<64x16xbf16>, vector<16x16xbf16>, vector<64x16xf32> -> vector<64x16xf32>
    %76 = arith.addf %70, %75 : vector<64x16xf32>
    %77 = vector.extract_strided_slice %63 {offsets = [0, 0, 0], sizes = [4, 16, 16], strides = [1, 1, 1]} : vector<6x16x16xbf16> to vector<4x16x16xbf16>
    %78 = vector.shape_cast %77 : vector<4x16x16xbf16> to vector<64x16xbf16>
    %c2 = arith.constant 2 : index
    %c0_33 = arith.constant 0 : index
    %c0_34 = arith.constant 0 : index
    %79 = vector.load %arg4[%c2, %c0_33, %c0_34] : memref<9x16x16xbf16, #tpu.memory_space<vmem>>, vector<1x16x16xbf16>
    %80 = vector.shape_cast %79 : vector<1x16x16xbf16> to vector<16x16xbf16>
    %cst_35 = arith.constant dense<0.000000e+00> : vector<64x16xf32>
    %81 = tpu.matmul %78, %80, %cst_35 {dimension_numbers = #tpu.dot_dimension_numbers<[1], [0], [0], [1], [0, 0, 1, 1], [], []>} : vector<64x16xbf16>, vector<16x16xbf16>, vector<64x16xf32> -> vector<64x16xf32>
    %82 = arith.addf %76, %81 : vector<64x16xf32>
    %83 = vector.extract_strided_slice %61 {offsets = [1, 0, 0], sizes = [4, 16, 16], strides = [1, 1, 1]} : vector<6x16x16xbf16> to vector<4x16x16xbf16>
    %84 = vector.shape_cast %83 : vector<4x16x16xbf16> to vector<64x16xbf16>
    %c3 = arith.constant 3 : index
    %c0_36 = arith.constant 0 : index
    %c0_37 = arith.constant 0 : index
    %85 = vector.load %arg4[%c3, %c0_36, %c0_37] : memref<9x16x16xbf16, #tpu.memory_space<vmem>>, vector<1x16x16xbf16>
    %86 = vector.shape_cast %85 : vector<1x16x16xbf16> to vector<16x16xbf16>
    %cst_38 = arith.constant dense<0.000000e+00> : vector<64x16xf32>
    %87 = tpu.matmul %84, %86, %cst_38 {dimension_numbers = #tpu.dot_dimension_numbers<[1], [0], [0], [1], [0, 0, 1, 1], [], []>} : vector<64x16xbf16>, vector<16x16xbf16>, vector<64x16xf32> -> vector<64x16xf32>
    %88 = arith.addf %82, %87 : vector<64x16xf32>
    %89 = vector.extract_strided_slice %58 {offsets = [1, 0, 0], sizes = [4, 16, 16], strides = [1, 1, 1]} : vector<6x16x16xbf16> to vector<4x16x16xbf16>
    %90 = vector.shape_cast %89 : vector<4x16x16xbf16> to vector<64x16xbf16>
    %c4 = arith.constant 4 : index
    %c0_39 = arith.constant 0 : index
    %c0_40 = arith.constant 0 : index
    %91 = vector.load %arg4[%c4, %c0_39, %c0_40] : memref<9x16x16xbf16, #tpu.memory_space<vmem>>, vector<1x16x16xbf16>
    %92 = vector.shape_cast %91 : vector<1x16x16xbf16> to vector<16x16xbf16>
    %cst_41 = arith.constant dense<0.000000e+00> : vector<64x16xf32>
    %93 = tpu.matmul %90, %92, %cst_41 {dimension_numbers = #tpu.dot_dimension_numbers<[1], [0], [0], [1], [0, 0, 1, 1], [], []>} : vector<64x16xbf16>, vector<16x16xbf16>, vector<64x16xf32> -> vector<64x16xf32>
    %94 = arith.addf %88, %93 : vector<64x16xf32>
    %95 = vector.extract_strided_slice %63 {offsets = [1, 0, 0], sizes = [4, 16, 16], strides = [1, 1, 1]} : vector<6x16x16xbf16> to vector<4x16x16xbf16>
    %96 = vector.shape_cast %95 : vector<4x16x16xbf16> to vector<64x16xbf16>
    %c5 = arith.constant 5 : index
    %c0_42 = arith.constant 0 : index
    %c0_43 = arith.constant 0 : index
    %97 = vector.load %arg4[%c5, %c0_42, %c0_43] : memref<9x16x16xbf16, #tpu.memory_space<vmem>>, vector<1x16x16xbf16>
    %98 = vector.shape_cast %97 : vector<1x16x16xbf16> to vector<16x16xbf16>
    %cst_44 = arith.constant dense<0.000000e+00> : vector<64x16xf32>
    %99 = tpu.matmul %96, %98, %cst_44 {dimension_numbers = #tpu.dot_dimension_numbers<[1], [0], [0], [1], [0, 0, 1, 1], [], []>} : vector<64x16xbf16>, vector<16x16xbf16>, vector<64x16xf32> -> vector<64x16xf32>
    %100 = arith.addf %94, %99 : vector<64x16xf32>
    %101 = vector.extract_strided_slice %61 {offsets = [2, 0, 0], sizes = [4, 16, 16], strides = [1, 1, 1]} : vector<6x16x16xbf16> to vector<4x16x16xbf16>
    %102 = vector.shape_cast %101 : vector<4x16x16xbf16> to vector<64x16xbf16>
    %c6 = arith.constant 6 : index
    %c0_45 = arith.constant 0 : index
    %c0_46 = arith.constant 0 : index
    %103 = vector.load %arg4[%c6, %c0_45, %c0_46] : memref<9x16x16xbf16, #tpu.memory_space<vmem>>, vector<1x16x16xbf16>
    %104 = vector.shape_cast %103 : vector<1x16x16xbf16> to vector<16x16xbf16>
    %cst_47 = arith.constant dense<0.000000e+00> : vector<64x16xf32>
    %105 = tpu.matmul %102, %104, %cst_47 {dimension_numbers = #tpu.dot_dimension_numbers<[1], [0], [0], [1], [0, 0, 1, 1], [], []>} : vector<64x16xbf16>, vector<16x16xbf16>, vector<64x16xf32> -> vector<64x16xf32>
    %106 = arith.addf %100, %105 : vector<64x16xf32>
    %107 = vector.extract_strided_slice %58 {offsets = [2, 0, 0], sizes = [4, 16, 16], strides = [1, 1, 1]} : vector<6x16x16xbf16> to vector<4x16x16xbf16>
    %108 = vector.shape_cast %107 : vector<4x16x16xbf16> to vector<64x16xbf16>
    %c7 = arith.constant 7 : index
    %c0_48 = arith.constant 0 : index
    %c0_49 = arith.constant 0 : index
    %109 = vector.load %arg4[%c7, %c0_48, %c0_49] : memref<9x16x16xbf16, #tpu.memory_space<vmem>>, vector<1x16x16xbf16>
    %110 = vector.shape_cast %109 : vector<1x16x16xbf16> to vector<16x16xbf16>
    %cst_50 = arith.constant dense<0.000000e+00> : vector<64x16xf32>
    %111 = tpu.matmul %108, %110, %cst_50 {dimension_numbers = #tpu.dot_dimension_numbers<[1], [0], [0], [1], [0, 0, 1, 1], [], []>} : vector<64x16xbf16>, vector<16x16xbf16>, vector<64x16xf32> -> vector<64x16xf32>
    %112 = arith.addf %106, %111 : vector<64x16xf32>
    %113 = vector.extract_strided_slice %63 {offsets = [2, 0, 0], sizes = [4, 16, 16], strides = [1, 1, 1]} : vector<6x16x16xbf16> to vector<4x16x16xbf16>
    %114 = vector.shape_cast %113 : vector<4x16x16xbf16> to vector<64x16xbf16>
    %c8 = arith.constant 8 : index
    %c0_51 = arith.constant 0 : index
    %c0_52 = arith.constant 0 : index
    %115 = vector.load %arg4[%c8, %c0_51, %c0_52] : memref<9x16x16xbf16, #tpu.memory_space<vmem>>, vector<1x16x16xbf16>
    %116 = vector.shape_cast %115 : vector<1x16x16xbf16> to vector<16x16xbf16>
    %cst_53 = arith.constant dense<0.000000e+00> : vector<64x16xf32>
    %117 = tpu.matmul %114, %116, %cst_53 {dimension_numbers = #tpu.dot_dimension_numbers<[1], [0], [0], [1], [0, 0, 1, 1], [], []>} : vector<64x16xbf16>, vector<16x16xbf16>, vector<64x16xf32> -> vector<64x16xf32>
    %118 = arith.addf %112, %117 : vector<64x16xf32>
    %119 = vector.shape_cast %118 : vector<64x16xf32> to vector<4x16x16xf32>
    %120 = arith.truncf %119 : vector<4x16x16xf32> to vector<4x16x16xbf16>
    %c0_54 = arith.constant 0 : index
    %c0_55 = arith.constant 0 : index
    %c0_56 = arith.constant 0 : index
    %c0_57 = arith.constant 0 : index
    %121 = vector.load %arg9[%c0_54, %c0_55, %c0_56, %c0_57] : memref<1x4x16x16xbf16, #tpu.memory_space<vmem>>, vector<1x4x16x16xbf16>
    %122 = vector.shape_cast %121 : vector<1x4x16x16xbf16> to vector<4x16x16xbf16>
    %123 = vector.shape_cast %120 : vector<4x16x16xbf16> to vector<1x4x16x16xbf16>
    tpu.vector_store %arg9[%c0_54, %c0_55, %c0_56, %c0_57], %123 {strides = array<i32>} : memref<1x4x16x16xbf16, #tpu.memory_space<vmem>>, vector<1x4x16x16xbf16>,
    %c0_i32_58 = arith.constant 0 : i32
    %124 = arith.cmpi eq, %arg1, %c0_i32_58 : i32
    %125 = arith.extui %124 : i1 to i32
    %c0_i32_59 = arith.constant 0 : i32
    %126 = arith.cmpi ne, %125, %c0_i32_59 : i32
    scf.if %126 {
      %cst_68 = arith.constant 0.000000e+00 : f32
      %139 = vector.broadcast %cst_68 : f32 to vector<2x16xf32>
      %c0_69 = arith.constant 0 : index
      %c0_70 = arith.constant 0 : index
      %c0_71 = arith.constant 0 : index
      %140 = vector.load %arg10[%c0_69, %c0_70, %c0_71] : memref<1x2x16xf32, #tpu.memory_space<vmem>>, vector<1x2x16xf32>
      %141 = vector.shape_cast %140 : vector<1x2x16xf32> to vector<2x16xf32>
      %142 = vector.shape_cast %139 : vector<2x16xf32> to vector<1x2x16xf32>
      tpu.vector_store %arg10[%c0_69, %c0_70, %c0_71], %142 {strides = array<i32>} : memref<1x2x16xf32, #tpu.memory_space<vmem>>, vector<1x2x16xf32>,
    } else {
    }
    %c0_60 = arith.constant 0 : index
    %c0_61 = arith.constant 0 : index
    %c0_62 = arith.constant 0 : index
    %127 = vector.load %arg10[%c0_60, %c0_61, %c0_62] : memref<1x2x16xf32, #tpu.memory_space<vmem>>, vector<1x2x16xf32>
    %128 = vector.shape_cast %127 : vector<1x2x16xf32> to vector<2x16xf32>
    %cst_63 = arith.constant dense<0.000000e+00> : vector<16xf32>
    %129 = vector.multi_reduction <add>, %118, %cst_63 [0] : vector<64x16xf32> to vector<16xf32>
    %130 = vector.shape_cast %129 : vector<16xf32> to vector<1x16xf32>
    %131 = arith.mulf %118, %118 : vector<64x16xf32>
    %cst_64 = arith.constant dense<0.000000e+00> : vector<16xf32>
    %132 = vector.multi_reduction <add>, %131, %cst_64 [0] : vector<64x16xf32> to vector<16xf32>
    %133 = vector.shape_cast %132 : vector<16xf32> to vector<1x16xf32>
    %134 = tpu.concatenate %130, %133 in 0 : vector<1x16xf32>, vector<1x16xf32> -> vector<2x16xf32>
    %135 = arith.addf %128, %134 : vector<2x16xf32>
    %c0_65 = arith.constant 0 : index
    %c0_66 = arith.constant 0 : index
    %c0_67 = arith.constant 0 : index
    %136 = vector.load %arg10[%c0_65, %c0_66, %c0_67] : memref<1x2x16xf32, #tpu.memory_space<vmem>>, vector<1x2x16xf32>
    %137 = vector.shape_cast %136 : vector<1x2x16xf32> to vector<2x16xf32>
    %138 = vector.shape_cast %135 : vector<2x16xf32> to vector<1x2x16xf32>
    tpu.vector_store %arg10[%c0_65, %c0_66, %c0_67], %138 {strides = array<i32>} : memref<1x2x16xf32, #tpu.memory_space<vmem>>, vector<1x2x16xf32>,
    return
  }
  func.func @transform_0(%arg0: i32, %arg1: i32) -> (i32, i32, i32, i32) {
    %c0_i32 = arith.constant 0 : i32
    %c0_i32_0 = arith.constant 0 : i32
    %c0_i32_1 = arith.constant 0 : i32
    return %arg0, %arg1, %c0_i32, %c0_i32_0 : i32, i32, i32, i32
  }
  func.func @transform_2(%arg0: i32, %arg1: i32) -> (i32, i32, i32) {
    %c0_i32 = arith.constant 0 : i32
    %c0_i32_0 = arith.constant 0 : i32
    %c0_i32_1 = arith.constant 0 : i32
    %c0_i32_2 = arith.constant 0 : i32
    return %c0_i32, %c0_i32_0, %c0_i32_1 : i32, i32, i32
  }
  func.func @transform_3(%arg0: i32, %arg1: i32) -> (i32, i32) {
    %c0_i32 = arith.constant 0 : i32
    %c0_i32_0 = arith.constant 0 : i32
    %c0_i32_1 = arith.constant 0 : i32
    return %c0_i32, %c0_i32_0 : i32, i32
  }
  func.func @transform_4(%arg0: i32, %arg1: i32) -> (i32, i32) {
    %c0_i32 = arith.constant 0 : i32
    %c0_i32_0 = arith.constant 0 : i32
    %c0_i32_1 = arith.constant 0 : i32
    return %c0_i32, %c0_i32_0 : i32, i32
  }
  func.func @transform_5(%arg0: i32, %arg1: i32) -> (i32, i32) {
    %c0_i32 = arith.constant 0 : i32
    %c0_i32_0 = arith.constant 0 : i32
    %c0_i32_1 = arith.constant 0 : i32
    return %c0_i32, %c0_i32_0 : i32, i32
  }
  func.func @transform_6(%arg0: i32, %arg1: i32) -> (i32, i32) {
    %c0_i32 = arith.constant 0 : i32
    %c0_i32_0 = arith.constant 0 : i32
    %c0_i32_1 = arith.constant 0 : i32
    return %c0_i32, %c0_i32_0 : i32, i32
  }
  func.func @transform_7(%arg0: i32, %arg1: i32) -> (i32, i32, i32, i32) {
    %c0_i32 = arith.constant 0 : i32
    %c0_i32_0 = arith.constant 0 : i32
    %c0_i32_1 = arith.constant 0 : i32
    return %arg0, %arg1, %c0_i32, %c0_i32_0 : i32, i32, i32, i32
  }
  func.func @transform_8(%arg0: i32, %arg1: i32) -> (i32, i32, i32) {
    %c0_i32 = arith.constant 0 : i32
    %c0_i32_0 = arith.constant 0 : i32
    %c0_i32_1 = arith.constant 0 : i32
    return %arg0, %c0_i32, %c0_i32_0 : i32, i32, i32
  }
}

module attributes {stable_mosaic.version = 11 : i64} {
  func.func @_bn2_conv3_kernel(%arg0: i32, %arg1: i32, %arg2: memref<1x4x16x16xbf16, #tpu.memory_space<vmem>>, %arg3: memref<16x64xbf16, #tpu.memory_space<vmem>>, %arg4: memref<1x16xf32, #tpu.memory_space<vmem>>, %arg5: memref<1x16xf32, #tpu.memory_space<vmem>>, %arg6: memref<1x16xf32, #tpu.memory_space<vmem>>, %arg7: memref<1x16xf32, #tpu.memory_space<vmem>>, %arg8: memref<1x4x16x64xbf16, #tpu.memory_space<vmem>>, %arg9: memref<1x2x64xf32, #tpu.memory_space<vmem>>) attributes {dimension_semantics = [#tpu.dimension_semantics<parallel>, #tpu.dimension_semantics<arbitrary>], iteration_bounds = array<i64: 2, 4>, scalar_prefetch = 0 : i64, scratch_operands = 0 : i64, tpu.core_type = #tpu.core_type<tc>, window_params = [{transform_indices = @transform_0, window_bounds = array<i64: 1, 4, 16, 16>}, {pipeline_mode = #tpu.pipeline_mode<synchronous>, transform_indices = @transform_1, window_bounds = array<i64: 16, 64>}, {pipeline_mode = #tpu.pipeline_mode<synchronous>, transform_indices = @transform_2, window_bounds = array<i64: 1, 16>}, {pipeline_mode = #tpu.pipeline_mode<synchronous>, transform_indices = @transform_3, window_bounds = array<i64: 1, 16>}, {pipeline_mode = #tpu.pipeline_mode<synchronous>, transform_indices = @transform_4, window_bounds = array<i64: 1, 16>}, {pipeline_mode = #tpu.pipeline_mode<synchronous>, transform_indices = @transform_5, window_bounds = array<i64: 1, 16>}, {transform_indices = @transform_6, window_bounds = array<i64: 1, 4, 16, 64>}, {transform_indices = @transform_7, window_bounds = array<i64: 1, 2, 64>}]} {
    %c0 = arith.constant 0 : index
    %c0_0 = arith.constant 0 : index
    %c0_1 = arith.constant 0 : index
    %c0_2 = arith.constant 0 : index
    %0 = vector.load %arg2[%c0, %c0_0, %c0_1, %c0_2] : memref<1x4x16x16xbf16, #tpu.memory_space<vmem>>, vector<1x4x16x16xbf16>
    %1 = vector.shape_cast %0 : vector<1x4x16x16xbf16> to vector<4x16x16xbf16>
    %2 = arith.extf %1 : vector<4x16x16xbf16> to vector<4x16x16xf32>
    %3 = vector.shape_cast %2 : vector<4x16x16xf32> to vector<64x16xf32>
    %c0_3 = arith.constant 0 : index
    %c0_4 = arith.constant 0 : index
    %4 = vector.load %arg4[%c0_3, %c0_4] : memref<1x16xf32, #tpu.memory_space<vmem>>, vector<1x16xf32>
    %c0_5 = arith.constant 0 : index
    %c0_6 = arith.constant 0 : index
    %5 = vector.load %arg5[%c0_5, %c0_6] : memref<1x16xf32, #tpu.memory_space<vmem>>, vector<1x16xf32>
    %c0_7 = arith.constant 0 : index
    %c0_8 = arith.constant 0 : index
    %6 = vector.load %arg6[%c0_7, %c0_8] : memref<1x16xf32, #tpu.memory_space<vmem>>, vector<1x16xf32>
    %c0_9 = arith.constant 0 : index
    %c0_10 = arith.constant 0 : index
    %7 = vector.load %arg7[%c0_9, %c0_10] : memref<1x16xf32, #tpu.memory_space<vmem>>, vector<1x16xf32>
    %8 = vector.broadcast %4 : vector<1x16xf32> to vector<64x16xf32>
    %9 = arith.subf %3, %8 : vector<64x16xf32>
    %10 = vector.broadcast %5 : vector<1x16xf32> to vector<64x16xf32>
    %11 = arith.mulf %9, %10 : vector<64x16xf32>
    %12 = vector.broadcast %6 : vector<1x16xf32> to vector<64x16xf32>
    %13 = arith.mulf %11, %12 : vector<64x16xf32>
    %14 = vector.broadcast %7 : vector<1x16xf32> to vector<64x16xf32>
    %15 = arith.addf %13, %14 : vector<64x16xf32>
    %cst = arith.constant 0.000000e+00 : f32
    %16 = vector.broadcast %cst : f32 to vector<64x16xf32>
    %17 = arith.maximumf %15, %16 : vector<64x16xf32>
    %18 = arith.truncf %17 : vector<64x16xf32> to vector<64x16xbf16>
    %c0_11 = arith.constant 0 : index
    %c0_12 = arith.constant 0 : index
    %19 = vector.load %arg3[%c0_11, %c0_12] : memref<16x64xbf16, #tpu.memory_space<vmem>>, vector<16x64xbf16>
    %cst_13 = arith.constant dense<0.000000e+00> : vector<64x64xf32>
    %20 = tpu.matmul %18, %19, %cst_13 {dimension_numbers = #tpu.dot_dimension_numbers<[1], [0], [0], [1], [0, 0, 1, 1], [], []>} : vector<64x16xbf16>, vector<16x64xbf16>, vector<64x64xf32> -> vector<64x64xf32>
    %21 = vector.shape_cast %20 : vector<64x64xf32> to vector<4x16x64xf32>
    %22 = arith.truncf %21 : vector<4x16x64xf32> to vector<4x16x64xbf16>
    %c0_14 = arith.constant 0 : index
    %c0_15 = arith.constant 0 : index
    %c0_16 = arith.constant 0 : index
    %c0_17 = arith.constant 0 : index
    %23 = vector.load %arg8[%c0_14, %c0_15, %c0_16, %c0_17] : memref<1x4x16x64xbf16, #tpu.memory_space<vmem>>, vector<1x4x16x64xbf16>
    %24 = vector.shape_cast %23 : vector<1x4x16x64xbf16> to vector<4x16x64xbf16>
    %25 = vector.shape_cast %22 : vector<4x16x64xbf16> to vector<1x4x16x64xbf16>
    tpu.vector_store %arg8[%c0_14, %c0_15, %c0_16, %c0_17], %25 {strides = array<i32>} : memref<1x4x16x64xbf16, #tpu.memory_space<vmem>>, vector<1x4x16x64xbf16>,
    %c0_i32 = arith.constant 0 : i32
    %26 = arith.cmpi eq, %arg1, %c0_i32 : i32
    %27 = arith.extui %26 : i1 to i32
    %c0_i32_18 = arith.constant 0 : i32
    %28 = arith.cmpi ne, %27, %c0_i32_18 : i32
    scf.if %28 {
      %cst_27 = arith.constant 0.000000e+00 : f32
      %41 = vector.broadcast %cst_27 : f32 to vector<2x64xf32>
      %c0_28 = arith.constant 0 : index
      %c0_29 = arith.constant 0 : index
      %c0_30 = arith.constant 0 : index
      %42 = vector.load %arg9[%c0_28, %c0_29, %c0_30] : memref<1x2x64xf32, #tpu.memory_space<vmem>>, vector<1x2x64xf32>
      %43 = vector.shape_cast %42 : vector<1x2x64xf32> to vector<2x64xf32>
      %44 = vector.shape_cast %41 : vector<2x64xf32> to vector<1x2x64xf32>
      tpu.vector_store %arg9[%c0_28, %c0_29, %c0_30], %44 {strides = array<i32>} : memref<1x2x64xf32, #tpu.memory_space<vmem>>, vector<1x2x64xf32>,
    } else {
    }
    %c0_19 = arith.constant 0 : index
    %c0_20 = arith.constant 0 : index
    %c0_21 = arith.constant 0 : index
    %29 = vector.load %arg9[%c0_19, %c0_20, %c0_21] : memref<1x2x64xf32, #tpu.memory_space<vmem>>, vector<1x2x64xf32>
    %30 = vector.shape_cast %29 : vector<1x2x64xf32> to vector<2x64xf32>
    %cst_22 = arith.constant dense<0.000000e+00> : vector<64xf32>
    %31 = vector.multi_reduction <add>, %20, %cst_22 [0] : vector<64x64xf32> to vector<64xf32>
    %32 = vector.shape_cast %31 : vector<64xf32> to vector<1x64xf32>
    %33 = arith.mulf %20, %20 : vector<64x64xf32>
    %cst_23 = arith.constant dense<0.000000e+00> : vector<64xf32>
    %34 = vector.multi_reduction <add>, %33, %cst_23 [0] : vector<64x64xf32> to vector<64xf32>
    %35 = vector.shape_cast %34 : vector<64xf32> to vector<1x64xf32>
    %36 = tpu.concatenate %32, %35 in 0 : vector<1x64xf32>, vector<1x64xf32> -> vector<2x64xf32>
    %37 = arith.addf %30, %36 : vector<2x64xf32>
    %c0_24 = arith.constant 0 : index
    %c0_25 = arith.constant 0 : index
    %c0_26 = arith.constant 0 : index
    %38 = vector.load %arg9[%c0_24, %c0_25, %c0_26] : memref<1x2x64xf32, #tpu.memory_space<vmem>>, vector<1x2x64xf32>
    %39 = vector.shape_cast %38 : vector<1x2x64xf32> to vector<2x64xf32>
    %40 = vector.shape_cast %37 : vector<2x64xf32> to vector<1x2x64xf32>
    tpu.vector_store %arg9[%c0_24, %c0_25, %c0_26], %40 {strides = array<i32>} : memref<1x2x64xf32, #tpu.memory_space<vmem>>, vector<1x2x64xf32>,
    return
  }
  func.func @transform_0(%arg0: i32, %arg1: i32) -> (i32, i32, i32, i32) {
    %c0_i32 = arith.constant 0 : i32
    %c0_i32_0 = arith.constant 0 : i32
    %c0_i32_1 = arith.constant 0 : i32
    return %arg0, %arg1, %c0_i32, %c0_i32_0 : i32, i32, i32, i32
  }
  func.func @transform_1(%arg0: i32, %arg1: i32) -> (i32, i32) {
    %c0_i32 = arith.constant 0 : i32
    %c0_i32_0 = arith.constant 0 : i32
    %c0_i32_1 = arith.constant 0 : i32
    return %c0_i32, %c0_i32_0 : i32, i32
  }
  func.func @transform_2(%arg0: i32, %arg1: i32) -> (i32, i32) {
    %c0_i32 = arith.constant 0 : i32
    %c0_i32_0 = arith.constant 0 : i32
    %c0_i32_1 = arith.constant 0 : i32
    return %c0_i32, %c0_i32_0 : i32, i32
  }
  func.func @transform_3(%arg0: i32, %arg1: i32) -> (i32, i32) {
    %c0_i32 = arith.constant 0 : i32
    %c0_i32_0 = arith.constant 0 : i32
    %c0_i32_1 = arith.constant 0 : i32
    return %c0_i32, %c0_i32_0 : i32, i32
  }
  func.func @transform_4(%arg0: i32, %arg1: i32) -> (i32, i32) {
    %c0_i32 = arith.constant 0 : i32
    %c0_i32_0 = arith.constant 0 : i32
    %c0_i32_1 = arith.constant 0 : i32
    return %c0_i32, %c0_i32_0 : i32, i32
  }
  func.func @transform_5(%arg0: i32, %arg1: i32) -> (i32, i32) {
    %c0_i32 = arith.constant 0 : i32
    %c0_i32_0 = arith.constant 0 : i32
    %c0_i32_1 = arith.constant 0 : i32
    return %c0_i32, %c0_i32_0 : i32, i32
  }
  func.func @transform_6(%arg0: i32, %arg1: i32) -> (i32, i32, i32, i32) {
    %c0_i32 = arith.constant 0 : i32
    %c0_i32_0 = arith.constant 0 : i32
    %c0_i32_1 = arith.constant 0 : i32
    return %arg0, %arg1, %c0_i32, %c0_i32_0 : i32, i32, i32, i32
  }
  func.func @transform_7(%arg0: i32, %arg1: i32) -> (i32, i32, i32) {
    %c0_i32 = arith.constant 0 : i32
    %c0_i32_0 = arith.constant 0 : i32
    %c0_i32_1 = arith.constant 0 : i32
    return %arg0, %c0_i32, %c0_i32_0 : i32, i32, i32
  }
}

module attributes {stable_mosaic.version = 11 : i64} {
  func.func @_bn3_residual_kernel(%arg0: i32, %arg1: i32, %arg2: memref<1x4x16x64xf32, #tpu.memory_space<vmem>>, %arg3: memref<1x4x16x64xbf16, #tpu.memory_space<vmem>>, %arg4: memref<1x64xf32, #tpu.memory_space<vmem>>, %arg5: memref<1x64xf32, #tpu.memory_space<vmem>>, %arg6: memref<1x64xf32, #tpu.memory_space<vmem>>, %arg7: memref<1x64xf32, #tpu.memory_space<vmem>>, %arg8: memref<1x4x16x64xf32, #tpu.memory_space<vmem>>) attributes {dimension_semantics = [#tpu.dimension_semantics<parallel>, #tpu.dimension_semantics<parallel>], iteration_bounds = array<i64: 2, 4>, scalar_prefetch = 0 : i64, scratch_operands = 0 : i64, tpu.core_type = #tpu.core_type<tc>, window_params = [{transform_indices = @transform_0, window_bounds = array<i64: 1, 4, 16, 64>}, {transform_indices = @transform_1, window_bounds = array<i64: 1, 4, 16, 64>}, {pipeline_mode = #tpu.pipeline_mode<synchronous>, transform_indices = @transform_2, window_bounds = array<i64: 1, 64>}, {pipeline_mode = #tpu.pipeline_mode<synchronous>, transform_indices = @transform_3, window_bounds = array<i64: 1, 64>}, {pipeline_mode = #tpu.pipeline_mode<synchronous>, transform_indices = @transform_4, window_bounds = array<i64: 1, 64>}, {pipeline_mode = #tpu.pipeline_mode<synchronous>, transform_indices = @transform_5, window_bounds = array<i64: 1, 64>}, {transform_indices = @transform_6, window_bounds = array<i64: 1, 4, 16, 64>}]} {
    %c0 = arith.constant 0 : index
    %c0_0 = arith.constant 0 : index
    %c0_1 = arith.constant 0 : index
    %c0_2 = arith.constant 0 : index
    %0 = vector.load %arg3[%c0, %c0_0, %c0_1, %c0_2] : memref<1x4x16x64xbf16, #tpu.memory_space<vmem>>, vector<1x4x16x64xbf16>
    %1 = vector.shape_cast %0 : vector<1x4x16x64xbf16> to vector<4x16x64xbf16>
    %2 = arith.extf %1 : vector<4x16x64xbf16> to vector<4x16x64xf32>
    %3 = vector.shape_cast %2 : vector<4x16x64xf32> to vector<64x64xf32>
    %c0_3 = arith.constant 0 : index
    %c0_4 = arith.constant 0 : index
    %4 = vector.load %arg4[%c0_3, %c0_4] : memref<1x64xf32, #tpu.memory_space<vmem>>, vector<1x64xf32>
    %c0_5 = arith.constant 0 : index
    %c0_6 = arith.constant 0 : index
    %5 = vector.load %arg5[%c0_5, %c0_6] : memref<1x64xf32, #tpu.memory_space<vmem>>, vector<1x64xf32>
    %c0_7 = arith.constant 0 : index
    %c0_8 = arith.constant 0 : index
    %6 = vector.load %arg6[%c0_7, %c0_8] : memref<1x64xf32, #tpu.memory_space<vmem>>, vector<1x64xf32>
    %c0_9 = arith.constant 0 : index
    %c0_10 = arith.constant 0 : index
    %7 = vector.load %arg7[%c0_9, %c0_10] : memref<1x64xf32, #tpu.memory_space<vmem>>, vector<1x64xf32>
    %8 = vector.broadcast %4 : vector<1x64xf32> to vector<64x64xf32>
    %9 = arith.subf %3, %8 : vector<64x64xf32>
    %10 = vector.broadcast %5 : vector<1x64xf32> to vector<64x64xf32>
    %11 = arith.mulf %9, %10 : vector<64x64xf32>
    %12 = vector.broadcast %6 : vector<1x64xf32> to vector<64x64xf32>
    %13 = arith.mulf %11, %12 : vector<64x64xf32>
    %14 = vector.broadcast %7 : vector<1x64xf32> to vector<64x64xf32>
    %15 = arith.addf %13, %14 : vector<64x64xf32>
    %c0_11 = arith.constant 0 : index
    %c0_12 = arith.constant 0 : index
    %c0_13 = arith.constant 0 : index
    %c0_14 = arith.constant 0 : index
    %16 = vector.load %arg2[%c0_11, %c0_12, %c0_13, %c0_14] : memref<1x4x16x64xf32, #tpu.memory_space<vmem>>, vector<1x4x16x64xf32>
    %17 = vector.shape_cast %16 : vector<1x4x16x64xf32> to vector<4x16x64xf32>
    %18 = vector.shape_cast %17 : vector<4x16x64xf32> to vector<64x64xf32>
    %19 = arith.addf %18, %15 : vector<64x64xf32>
    %cst = arith.constant 0.000000e+00 : f32
    %20 = vector.broadcast %cst : f32 to vector<64x64xf32>
    %21 = arith.maximumf %19, %20 : vector<64x64xf32>
    %22 = vector.shape_cast %21 : vector<64x64xf32> to vector<4x16x64xf32>
    %c0_15 = arith.constant 0 : index
    %c0_16 = arith.constant 0 : index
    %c0_17 = arith.constant 0 : index
    %c0_18 = arith.constant 0 : index
    %23 = vector.load %arg8[%c0_15, %c0_16, %c0_17, %c0_18] : memref<1x4x16x64xf32, #tpu.memory_space<vmem>>, vector<1x4x16x64xf32>
    %24 = vector.shape_cast %23 : vector<1x4x16x64xf32> to vector<4x16x64xf32>
    %25 = vector.shape_cast %22 : vector<4x16x64xf32> to vector<1x4x16x64xf32>
    tpu.vector_store %arg8[%c0_15, %c0_16, %c0_17, %c0_18], %25 {strides = array<i32>} : memref<1x4x16x64xf32, #tpu.memory_space<vmem>>, vector<1x4x16x64xf32>,
    return
  }
  func.func @transform_0(%arg0: i32, %arg1: i32) -> (i32, i32, i32, i32) {
    %c0_i32 = arith.constant 0 : i32
    %c0_i32_0 = arith.constant 0 : i32
    %c0_i32_1 = arith.constant 0 : i32
    return %arg0, %arg1, %c0_i32, %c0_i32_0 : i32, i32, i32, i32
  }
  func.func @transform_1(%arg0: i32, %arg1: i32) -> (i32, i32, i32, i32) {
    %c0_i32 = arith.constant 0 : i32
    %c0_i32_0 = arith.constant 0 : i32
    %c0_i32_1 = arith.constant 0 : i32
    return %arg0, %arg1, %c0_i32, %c0_i32_0 : i32, i32, i32, i32
  }
  func.func @transform_2(%arg0: i32, %arg1: i32) -> (i32, i32) {
    %c0_i32 = arith.constant 0 : i32
    %c0_i32_0 = arith.constant 0 : i32
    %c0_i32_1 = arith.constant 0 : i32
    return %c0_i32, %c0_i32_0 : i32, i32
  }
  func.func @transform_3(%arg0: i32, %arg1: i32) -> (i32, i32) {
    %c0_i32 = arith.constant 0 : i32
    %c0_i32_0 = arith.constant 0 : i32
    %c0_i32_1 = arith.constant 0 : i32
    return %c0_i32, %c0_i32_0 : i32, i32
  }
  func.func @transform_4(%arg0: i32, %arg1: i32) -> (i32, i32) {
    %c0_i32 = arith.constant 0 : i32
    %c0_i32_0 = arith.constant 0 : i32
    %c0_i32_1 = arith.constant 0 : i32
    return %c0_i32, %c0_i32_0 : i32, i32
  }
  func.func @transform_5(%arg0: i32, %arg1: i32) -> (i32, i32) {
    %c0_i32 = arith.constant 0 : i32
    %c0_i32_0 = arith.constant 0 : i32
    %c0_i32_1 = arith.constant 0 : i32
    return %c0_i32, %c0_i32_0 : i32, i32
  }
  func.func @transform_6(%arg0: i32, %arg1: i32) -> (i32, i32, i32, i32) {
    %c0_i32 = arith.constant 0 : i32
    %c0_i32_0 = arith.constant 0 : i32
    %c0_i32_1 = arith.constant 0 : i32
    return %arg0, %arg1, %c0_i32, %c0_i32_0 : i32, i32, i32, i32
  }
}

</mosaic_0001>

<bundles_post_ra>
// kernel: bottleneck_forward.6
= control target key start
LH: loop header
LB: loop body
LE: loop exit
PB: predicated region body
PF: predicated region fallthrough
CT: control target
= control target key end

     0   :  { %s845_s24 = smov 0   ;;  %s847_s25 = smov 0   ;;  %s958_s0 = inlined_call_operand.vmem [shape: bf16[2,16,16,16], index: 0, kind: input, shape index: {}]   ;;  %s959_s1 = inlined_call_operand.vmem [shape: bf16[16,64], index: 1, kind: input, shape index: {}]   ;;  %s960_s2 = inlined_call_operand.vmem [shape: f32[1,16], index: 2, kind: input, shape index: {}]   ;;  %s961_s3 = inlined_call_operand.vmem [shape: f32[1,16], index: 3, kind: input, shape index: {}]   ;;  %s962_s4 = inlined_call_operand.vmem [shape: f32[1,16], index: 4, kind: input, shape index: {}]   ;;  %s963_s5 = inlined_call_operand.vmem [shape: f32[1,16], index: 5, kind: input, shape index: {}]   ;;  %s964_s6 = inlined_call_operand.vmem [shape: bf16[2,16,16,64], index: 6, kind: output, shape index: {0}]   ;;  %s965_s7 = inlined_call_operand.vmem [shape: f32[2,2,64], index: 7, kind: output, shape index: {1}]  }
   0x1   :  { %s849_s26 = smov 0   ;;  %s851_s27 = smov 0  }
   0x2   :  { %s853_s28 = smov 0  }
   0x3 LB: > { %s27_s29 = sadd.s32 1, %s794_s26  ;;  %s30_s30 = sadd.s32 1, %s798_s27  ;;  %s802_s28 = sphi %s853_s28, %s18_s28   ;;  %s798_s27 = sphi %s851_s27, %s969_s27   ;;  %s794_s26 = sphi %s849_s26, %s968_s26   ;;  %s790_s25 = sphi %s847_s25, %s967_s25   ;;  %s786_s24 = sphi %s845_s24, %s966_s24  }
   0x4   : > { %p28_p0 = scmp.ge.s32.totalorder %s27_s29, 4  ;;  %p675_p1 = scmp.ge.s32.totalorder %s802_s28, 1 }
   0x5   : > { %p262_p2 = scmp.lt.s32.totalorder %s802_s28, 9 }
   0x6   : > { %s971_s29 = smov (%p28_p0, %s27_s29), 0  ;;  %s973_s30 = smov (!%p28_p0, %s30_s30), %s798_s27 }
   0x7   : > { %p263_p3 = pnand %p675_p1, %p262_p2  ;;  %p32_p4 = scmp.ge.s32.totalorder %s973_s30, 2 }
   0x8   : > { %s676_s10 = sshll.u32 (!%p263_p3), %s786_s24, 2  ;;  %p309_p5 = scmp.lt.s32.totalorder (!%p263_p3), %s790_s25, 1 }
   0x9   : > { %s975_s30 = smov (%p32_p4, %s973_s30), 0  ;;  %266 = sbr.rel (%p263_p3) target bundleno = 216 (0xd8), region = 44 }
   0xa   : > { %p311_p6 = scmp.lt.s32.totalorder (!%p263_p3), %s676_s10, 15  ;;  %p693_p7 = scmp.ne.s32.totalorder (!%p263_p3), %s786_s24, 0 }
   0xe   : > { %v696_v0 = vld [vmem:[%s959_s1] sm:$0xff]  ;;  %s977_s25 = smov (!%p309_p5, %s790_s25), 1  ;;  %s979_s10 = smov (!%p311_p6, %s676_s10), 15  ;;  %vm419_vm0 = vcmask 130048   ;;  %vm469_vm1 = vcmask 519168  }
   0xf   : > { %439 = vmatpush.bf16.msra.mxu0 %v696_v0  ;;  %716 = vmatpush.bf16.msra.mxu1 %v696_v0  ;;  %s678_s11 = sshll.u32 %s977_s25, 5  ;;  %s684_s12 = sshll.u32 %s977_s25, 1  ;;  %v760_v1 = vld [vmem:[%s960_s2] ss:$0 sm:$0xff] }
  0x10   : > { %717 = vmatpush.bf16.msra.mxu2 %v696_v0  ;;  %718 = vmatpush.bf16.msra.mxu3 %v696_v0  ;;  %s677_s13 = sshll.u32 %s979_s10, 1  ;;  %s884_s16 = scalar_lea.vmem %s965_s7, %s684_s12  ;;  %v761_v7 = vld [vmem:[%s961_s3] ss:$0 sm:$0xff] }
  0x11   : > { %s886_s17 = sadd.s32 %s678_s11, %s677_s13  ;;  %v762_v17 = vld [vmem:[%s962_s4] ss:$0 sm:$0xff] }
  0x12   : > { %s679_s18 = sshll.u32 %s886_s17, 2  ;;  %v763_v26 = vld [vmem:[%s963_s5] ss:$0 sm:$0xff] }
  0x13   : > { %s317_s21 = scalar_lea.vmem %s958_s0, %s679_s18  ;;  %s328_s15 = scalar_lea.vmem %s964_s6, %s679_s18 }
  0x14   : > { %v698_v2 = vld [vmem:[%s317_s21] sm:$0xff]   ;;  %v713_v3 = vld [vmem:[%s317_s21 + $0x8] sm:$0xff]   ;;  %v714_v4 = vld [vmem:[%s317_s21 + $0x10] sm:$0xff]  }
  0x15   : > { %v699_v5 = vunpack.c.l.bf16 %v698_v2  ;;  %v700_v6 = vunpack.c.h.bf16 %v698_v2  ;;  %v703_v8 = vunpack.c.l.bf16 %v713_v3  ;;  %v704_v9 = vunpack.c.h.bf16 %v713_v3  ;;  %v715_v10 = vld [vmem:[%s317_s21 + $0x18] sm:$0xff]  }
  0x16   : > { %v707_v11 = vunpack.c.l.bf16 %v714_v4  ;;  %v708_v12 = vunpack.c.h.bf16 %v714_v4  ;;  %v711_v13 = vunpack.c.l.bf16 %v715_v10  ;;  %v712_v14 = vunpack.c.h.bf16 %v715_v10 }
  0x17   : > { %v358_v15 = vsub.f32 %v699_v5, %v760_v1  ;;  %v359_v16 = vsub.f32 %v700_v6, %v760_v1  ;;  %v360_v18 = vsub.f32 %v703_v8, %v760_v1  ;;  %v361_v19 = vsub.f32 %v704_v9, %v760_v1 }
  0x18   : > { %v362_v20 = vsub.f32 %v707_v11, %v760_v1  ;;  %v363_v21 = vsub.f32 %v708_v12, %v760_v1  ;;  %v364_v22 = vsub.f32 %v711_v13, %v760_v1  ;;  %v365_v23 = vsub.f32 %v712_v14, %v760_v1 }
  0x19   : > { %v369_v24 = vmul.f32 %v761_v7, %v358_v15  ;;  %v370_v25 = vmul.f32 %v761_v7, %v359_v16  ;;  %v371_v27 = vmul.f32 %v761_v7, %v360_v18  ;;  %v372_v28 = vmul.f32 %v761_v7, %v361_v19 }
  0x1a   : > { %v373_v29 = vmul.f32 %v761_v7, %v362_v20  ;;  %v374_v30 = vmul.f32 %v761_v7, %v363_v21  ;;  %v375_v31 = vmul.f32 %v761_v7, %v364_v22  ;;  %v376_v32 = vmul.f32 %v761_v7, %v365_v23 }
  0x1b   : > { %v380_v33 = vmul.f32 %v762_v17, %v369_v24  ;;  %v381_v34 = vmul.f32 %v762_v17, %v370_v25  ;;  %v382_v35 = vmul.f32 %v762_v17, %v371_v27  ;;  %v383_v36 = vmul.f32 %v762_v17, %v372_v28 }
  0x1c   : > { %v384_v37 = vmul.f32 %v762_v17, %v373_v29  ;;  %v385_v38 = vmul.f32 %v762_v17, %v374_v30  ;;  %v386_v39 = vmul.f32 %v762_v17, %v375_v31  ;;  %v387_v40 = vmul.f32 %v762_v17, %v376_v32 }
  0x1d   : > { %v391_v41 = vadd.f32 %v763_v26, %v380_v33  ;;  %v392_v42 = vadd.f32 %v763_v26, %v381_v34  ;;  %v393_v43 = vadd.f32 %v763_v26, %v382_v35  ;;  %v394_v44 = vadd.f32 %v763_v26, %v383_v36 }
  0x1e   : > { %v395_v45 = vadd.f32 %v763_v26, %v384_v37  ;;  %v396_v46 = vadd.f32 %v763_v26, %v385_v38  ;;  %v397_v47 = vadd.f32 %v763_v26, %v386_v39  ;;  %v398_v48 = vadd.f32 %v763_v26, %v387_v40 }
  0x1f   : > { %v399_v49 = vmax.f32 %v391_v41, 0.0  ;;  %v400_v50 = vmax.f32 %v392_v42, 0.0  ;;  %v401_v51 = vmax.f32 %v393_v43, 0.0  ;;  %v402_v52 = vmax.f32 %v394_v44, 0.0 }
  0x20   : > { %v403_v53 = vmax.f32 %v395_v45, 0.0  ;;  %v404_v54 = vmax.f32 %v396_v46, 0.0  ;;  %v405_v55 = vmax.f32 %v397_v47, 0.0  ;;  %v406_v56 = vmax.f32 %v398_v48, 0.0 }
  0x21   : > { %v407_v57 = vpack.c.bf16 %v400_v50, %v399_v49  ;;  %v408_v58 = vpack.c.bf16 %v402_v52, %v401_v51 }
  0x22   : > { %v409_v59 = vpack.c.bf16 %v404_v54, %v403_v53  ;;  %v410_v60 = vpack.c.bf16 %v406_v56, %v405_v55 }
  0x23   : > { %689 = vmatmul.msk.bf16.vlgmr.msra.gmra.mxu0 %vm419_vm0, %v407_v57  ;;  %690 = vmatmul.msk.bf16.vlgmr.msra.gmra.mxu1 %vm419_vm0, %v408_v58 }
  0x24   : > { %691 = vmatmul.msk.bf16.vlgmr.msra.gmra.mxu2 %vm419_vm0, %v409_v59  ;;  %692 = vmatmul.msk.bf16.vlgmr.msra.gmra.mxu3 %vm419_vm0, %v410_v60 }
  0xa0   : > { %v441_v61 = vpop.f32.mrf.mxu0  ;;  %v446_v62 = vpop.f32.mrf.mxu1 }
  0xa1   : > { %v461_v63 = vpack.c.bf16 %v441_v61, %v441_v61  ;;  %v463_v0 = vpack.c.bf16 %v446_v62, %v446_v62 }
  0xa3   : > { %470 = vst.msk [vmem:[%s328_s15] sm:$0xf] %vm469_vm1, %v461_v63 }
  0xa4   : > { %472 = vst.msk [vmem:[%s328_s15 + $0x8] sm:$0xf] %vm469_vm1, %v463_v0 }
  0xa7   : > { %v451_v1 = vpop.f32.mrf.mxu2  ;;  %v456_v2 = vpop.f32.mrf.mxu3 }
  0xa8   : > { %v465_v3 = vpack.c.bf16 %v451_v1, %v451_v1  ;;  %v467_v4 = vpack.c.bf16 %v456_v2, %v456_v2  ;;  %v443_v5 = vpop.f32.mrf.mxu0  ;;  %v448_v6 = vpop.f32.mrf.mxu1 }
  0xa9   : > { %v462_v7 = vpack.c.bf16 %v443_v5, %v443_v5  ;;  %v464_v8 = vpack.c.bf16 %v448_v6, %v448_v6 }
  0xaa   : > { %474 = vst.msk [vmem:[%s328_s15 + $0x10] sm:$0xf] %vm469_vm1, %v465_v3 }
  0xab   : > { %476 = vst.msk [vmem:[%s328_s15 + $0x18] sm:$0xf] %vm469_vm1, %v467_v4 }
  0xac   : > { %471 = vst.msk [vmem:[%s328_s15 + $0x4] sm:$0xf] %vm469_vm1, %v462_v7 }
  0xad   : > { %473 = vst.msk [vmem:[%s328_s15 + $0xc] sm:$0xf] %vm469_vm1, %v464_v8 }
  0xaf   : > { %v453_v9 = vpop.f32.mrf.mxu2  ;;  %v458_v10 = vpop.f32.mrf.mxu3  ;;  %481 = sbr.rel (%p693_p7) target bundleno = 182 (0xb6), region = 48 }
  0xb0   : > { %v466_v11 = vpack.c.bf16 %v453_v9, %v453_v9  ;;  %v468_v12 = vpack.c.bf16 %v458_v10, %v458_v10 }
  0xb2   : > { %475 = vst.msk [vmem:[%s328_s15 + $0x14] sm:$0xf] %vm469_vm1, %v466_v11 }
  0xb3   : > { %477 = vst.msk [vmem:[%s328_s15 + $0x1c] sm:$0xf] %vm469_vm1, %v468_v12 }
  0xb4   : > { %vm482_vm2 = vcmask 517120   ;;  %v804_v13 = vmov 0.0  }
  0xb5   : > { %483 = vst.msk [vmem:[%s884_s16] sm:$0x3] %vm482_vm2, %v804_v13 }
  0xb6 PF: > { %vm485_vm3 = vcmask 523264   ;;  %v507_v14 = vmul.f32 %v441_v61, %v441_v61  ;;  %v508_v15 = vmul.f32 %v443_v5, %v443_v5  ;;  %v509_v19 = vmul.f32 %v446_v62, %v446_v62 }
  0xb7   : > { %v486_v16 = vsel %vm485_vm3, %v441_v61, 0.0  ;;  %v487_v17 = vsel %vm485_vm3, %v443_v5, 0.0  ;;  %v489_v18 = vsel %vm485_vm3, %v446_v62, 0.0  ;;  %v491_v21 = vsel %vm485_vm3, %v448_v6, 0.0 }
  0xb8   : > { %v488_v20 = vadd.f32 %v487_v17, %v486_v16  ;;  %v510_v22 = vmul.f32 %v448_v6, %v448_v6  ;;  %v515_v24 = vsel %vm485_vm3, %v507_v14, 0.0  ;;  %v493_v25 = vsel %vm485_vm3, %v451_v1, 0.0 }
  0xb9   : > { %v511_v26 = vmul.f32 %v451_v1, %v451_v1  ;;  %v516_v27 = vsel %vm485_vm3, %v508_v15, 0.0  ;;  %v518_v28 = vsel %vm485_vm3, %v509_v19, 0.0  ;;  %v495_v31 = vsel %vm485_vm3, %v453_v9, 0.0 }
  0xba   : > { %v490_v23 = vadd.f32 %v489_v18, %v488_v20  ;;  %v517_v30 = vadd.f32 %v516_v27, %v515_v24  ;;  %v512_v32 = vmul.f32 %v453_v9, %v453_v9  ;;  %v520_v33 = vsel %vm485_vm3, %v510_v22, 0.0 }
  0xbb   : > { %v497_v36 = vsel %vm485_vm3, %v456_v2, 0.0  ;;  %v513_v37 = vmul.f32 %v456_v2, %v456_v2  ;;  %v522_v38 = vsel %vm485_vm3, %v511_v26, 0.0  ;;  %v499_v41 = vsel %vm485_vm3, %v458_v10, 0.0 }
  0xbc   : > { %v492_v29 = vadd.f32 %v491_v21, %v490_v23  ;;  %v519_v35 = vadd.f32 %v518_v28, %v517_v30  ;;  %v514_v42 = vmul.f32 %v458_v10, %v458_v10  ;;  %v524_v43 = vsel %vm485_vm3, %v512_v32, 0.0  ;;  %v484_v63 = vld [vmem:[%s884_s16] sm:$0x3] }
  0xbd   : > { %v526_v46 = vsel %vm485_vm3, %v513_v37, 0.0  ;;  %vm536_vm4 = vcmask 1040384   ;;  %vm539_vm5 = vcmask 517120  }
  0xbe   : > { %v494_v34 = vadd.f32 %v493_v25, %v492_v29  ;;  %v521_v40 = vadd.f32 %v520_v33, %v519_v35  ;;  %v528_v49 = vsel %vm485_vm3, %v514_v42, 0.0 }
  0xc0   : > { %v496_v39 = vadd.f32 %v495_v31, %v494_v34  ;;  %v523_v45 = vadd.f32 %v522_v38, %v521_v40 }
  0xc2   : > { %v498_v44 = vadd.f32 %v497_v36, %v496_v39  ;;  %v525_v48 = vadd.f32 %v524_v43, %v523_v45 }
  0xc4   : > { %v500_v47 = vadd.f32 %v499_v41, %v498_v44  ;;  %v527_v51 = vadd.f32 %v526_v46, %v525_v48 }
  0xc6   : > { %v501_v50 = vrot.slane %v500_v47, 4  ;;  %v529_v53 = vadd.f32 %v528_v49, %v527_v51 }
  0xc8   : > { %v502_v52 = vadd.f32 %v501_v50, %v500_v47  ;;  %v530_v55 = vrot.slane %v529_v53, 4 }
  0xca   : > { %v503_v54 = vrot.slane %v502_v52, 2  ;;  %v531_v57 = vadd.f32 %v530_v55, %v529_v53 }
  0xcc   : > { %v504_v56 = vadd.f32 %v503_v54, %v502_v52  ;;  %v532_v59 = vrot.slane %v531_v57, 2 }
  0xce   : > { %v505_v58 = vrot.slane %v504_v56, 1  ;;  %v533_v60 = vadd.f32 %v532_v59, %v531_v57 }
  0xd0   : > { %v506_v61 = vadd.f32 %v505_v58, %v504_v56  ;;  %v534_v62 = vrot.slane %v533_v60, 1 }
  0xd2   : > { %v535_v0 = vadd.f32 %v534_v62, %v533_v60 }
  0xd4   : > { %v537_v1 = vsel %vm536_vm4, %v506_v61, %v535_v0 }
  0xd5   : > { %v538_v2 = vadd.f32 %v537_v1, %v484_v63 }
  0xd7   : > { %540 = vst.msk [vmem:[%s884_s16] sm:$0x3] %vm539_vm5, %v538_v2 }
  0xd8 PF: > { %s18_s28 = sadd.s32 1, %s802_s28   ;;  %s966_s24 = smov %s794_s26 }
  0xd9   : > { %p15_p8 = scmp.ge.s32.totalorder %s18_s28, 10   ;;  %s967_s25 = smov %s798_s27 }
  0xda   : > { %s968_s26 = smov %s971_s29  ;;  %s969_s27 = smov %s975_s30 }
  0xdb   :  { %17 = sbr.rel (!%p15_p8) target bundleno = 3 (0x3), region = 90 }

// kernel: bottleneck_forward.4
= control target key start
LH: loop header
LB: loop body
LE: loop exit
PB: predicated region body
PF: predicated region fallthrough
CT: control target
= control target key end

     0   :  { %9 = vsyncpa [#allocation3], 0  ;;  %s975_s0 = inlined_call_operand.hbm [shape: f32[2,16,16,64], index: 0, kind: input, shape index: {}]   ;;  %s976_s1 = inlined_call_operand.vmem [shape: bf16[64,16], index: 1, kind: input, shape index: {}]   ;;  %s977_s2 = inlined_call_operand.vmem [shape: bf16[2,16,16,16], index: 2, kind: output, shape index: {0}]   ;;  %s978_s3 = inlined_call_operand.vmem [shape: f32[2,2,16], index: 3, kind: output, shape index: {1}]  }
   0x1   :  { %11 = vsyncpa [#allocation3 + $0x1], 0  ;;  %s812_s12 = smov 0   ;;  %s814_s13 = smov 0  }
   0x2   :  { %s816_s14 = smov 0   ;;  %s818_s15 = smov 0  }
   0x3   :  { %s820_s16 = smov 0   ;;  %s822_s17 = smov 0  }
   0x4   :  { %s824_s18 = smov 0   ;;  %s826_s19 = smov 0  }
   0x5 LB: > { %s561_s20 = sadd.s32 4294967295, %s787_s19   ;;  %s26_s21 = sadd.s32 1, %s779_s17  ;;  %s787_s19 = sphi %s826_s19, %s17_s19   ;;  %s783_s18 = sphi %s824_s18, %s987_s18   ;;  %s779_s17 = sphi %s822_s17, %s986_s17   ;;  %s775_s16 = sphi %s820_s16, %s985_s16   ;;  %s771_s15 = sphi %s818_s15, %s984_s15   ;;  %s767_s14 = sphi %s816_s14, %s983_s14   ;;  %s763_s13 = sphi %s814_s13, %s982_s13   ;;  %s759_s12 = sphi %s812_s12, %s981_s12  }
   0x6   : > { %p27_p0 = scmp.ge.s32.totalorder %s26_s21, 4  ;;  %s29_s22 = sadd.s32 1, %s783_s18 }
   0x7   : > { %s38_s23 = sadd.s32 1, %s767_s14  ;;  %p45_p1 = scmp.ne.s32.totalorder %s767_s14, %s763_s13 }
   0x8   : > { %s989_s21 = smov (%p27_p0, %s26_s21), 0  ;;  %s991_s22 = smov (!%p27_p0, %s29_s22), %s783_s18 }
   0x9   : > { %s34_s24 = ssub.s32 %s779_s17, %s989_s21  ;;  %p46_p2 = scmp.eq.s32.totalorder %s787_s19, 0 }
   0xa   : > { %p31_p3 = scmp.ge.s32.totalorder %s991_s22, 2  ;;  %p51_p4 = scmp.ne.s32.totalorder %s763_s13, %s759_s12 }
   0xb   : > { %p863_p5 = por %p46_p2, %p45_p1  ;;  %p52_p6 = scmp.eq.s32.totalorder %s561_s20, 0 }
   0xc   : > { %s993_s22 = smov (%p31_p3, %s991_s22), 0  ;;  %p623_p8 = scmp.lt.s32.totalorder %s787_s19, 8 }
   0xd   : > { %p869_p7 = por %p52_p6, %p51_p4  ;;  %s33_s27 = ssub.s32 %s783_s18, %s993_s22 }
   0xe   : > { %s35_s28 = sor.u32 %s34_s24, %s33_s27  ;;  %s153_s29 = sand.u32 1, %s767_s14  }
   0xf   : > { %p36_p9 = scmp.eq.s32.totalorder %s35_s28, 0  ;;  %s565_s30 = sshll.u32 %s153_s29, 6 }
  0x10   : > { %s600_s4 = sshll.u32 %s779_s17, 3  ;;  %s568_s6 = sshll.u32 %s783_s18, 5 }
  0x11   : > { %s879_s5 = scalar_select %p36_p9, %s767_s14, %s38_s23  }
  0x12   : > { %s163_s7 = sadd.s32 %s600_s4, %s568_s6  ;;  %s157_s8 = scalar_lea.vmem [#allocation2], %s565_s30 }
  0x13   : > { %s168_s9 = sshll.u32 %s157_s8, 4  ;;  %s569_s10 = sshll.u32 %s163_s7, 3  ;;  %s169_s9 = int_to_ptr.vmem [resolvable:$true] %s168_s9 }
  0x14   : > { %s165_s20 = scalar_lea.hbm %s975_s0, %s569_s10  ;;  %p620_p10 = pnand %p623_p8, %p863_p5 }
  0x15   : > { %s166_s24 = sshll.u32 %s165_s20, 4  ;;  %p570_p11 = scmp.ge.s32.totalorder %s787_s19, 1  ;;  %s167_s24 = int_to_ptr.hbm [resolvable:$true] %s166_s24 }
  0x16   : > { %s154_s27 = scalar_lea.sflag [#allocation3], %s153_s29  ;;  %s789_s23 = smov 128  }
  0x17   : > { %s790_s28 = smov 8   ;;  %p176_p12 = scmp.lt.s32.totalorder %s787_s19, 9 }
  0x18   : > { %622 = dma.hbm_to_vmem [thread:$0]  (!%p620_p10), %s167_s24, 1024, %s169_s9, %s154_s27, %s789_s23, %s789_s23, %s790_s28  }
  0x19   : > { %p177_p13 = pnand %p570_p11, %p176_p12 }
  0x1a   : > { %s182_s30 = sand.u32 (!%p177_p13), 1, %s763_s13  }
  0x1b   : > { %180 = sbr.rel (%p177_p13) target bundleno = 230 (0xe6), region = 28  ;;  %s571_s4 = sshll.u32 (!%p177_p13), %s182_s30, 6 }
  0x1c   : > { %s183_s6 = scalar_lea.sflag (!%p177_p13), [#allocation3], %s182_s30  ;;  %s186_s7 = scalar_lea.vmem (!%p177_p13), [#allocation2], %s571_s4 }
  0x20   : > { %754 = dma.done.wait (%p869_p7), %s183_s6, 1024  }
  0x21   : > { %756 = vsyncadd (%p869_p7), %s183_s6, 4294966272  ;;  %p221_p0 = scmp.lt.s32.totalorder %s775_s16, 1  ;;  %v604_v0 = vld [vmem:[%s976_s1 + $0x18] sm:$0xff]  ;;  %v603_v1 = vld [vmem:[%s976_s1 + $0x10] sm:$0xff]  ;;  %vm304_vm0 = vcmask 523264   ;;  %s572_s28 = sshll.u32 %s771_s15, 2 }
  0x22   : > { %v236_v2 = vld [vmem:[%s186_s7] sm:$0xff]  ;;  %v237_v3 = vld [vmem:[%s186_s7 + $0x8] sm:$0xff]  ;;  %321 = vmatpush.bf16.msra.mxu0 %v604_v0  ;;  %605 = vmatpush.bf16.msra.mxu1 %v604_v0  ;;  %v238_v4 = vld [vmem:[%s186_s7 + $0x10] sm:$0xff]  ;;  %p223_p1 = scmp.lt.s32.totalorder %s572_s28, 15  ;;  %vm354_vm1 = vcmask 125952   ;;  %p597_p2 = scmp.ne.s32.totalorder %s771_s15, 0 }
  0x23   : > { %s995_s16 = smov (!%p221_p0, %s775_s16), 1  ;;  %v239_v5 = vld [vmem:[%s186_s7 + $0x18] sm:$0xff]  ;;  %v240_v6 = vld [vmem:[%s186_s7 + $0x20] sm:$0xff]  ;;  %606 = vmatpush.bf16.msra.mxu2 %v604_v0  ;;  %607 = vmatpush.bf16.msra.mxu3 %v604_v0  ;;  %v241_v7 = vld [vmem:[%s186_s7 + $0x28] sm:$0xff]  ;;  %v244_v10 = vpack.c.bf16 %v236_v2, %v236_v2  ;;  %v245_v11 = vpack.c.bf16 %v237_v3, %v237_v3  ;;  %v246_v12 = vpack.c.bf16 %v238_v4, %v238_v4 }
  0x24   : > { %s576_s25 = sshll.u32 %s995_s16, 1  ;;  %v242_v8 = vld [vmem:[%s186_s7 + $0x30] sm:$0xff]  ;;  %v243_v9 = vld [vmem:[%s186_s7 + $0x38] sm:$0xff]  ;;  %v247_v13 = vpack.c.bf16 %v239_v5, %v239_v5  ;;  %v248_v14 = vpack.c.bf16 %v240_v6, %v240_v6  ;;  %v602_v15 = vld [vmem:[%s976_s1 + $0x8] sm:$0xff]  ;;  %v249_v16 = vpack.c.bf16 %v241_v7, %v241_v7  ;;  %s997_s28 = smov (!%p223_p1, %s572_s28), 15 }
  0x25   : > { %s904_s9 = scalar_lea.vmem %s978_s3, %s576_s25  ;;  %v250_v17 = vpack.c.bf16 %v242_v8, %v242_v8  ;;  %v251_v18 = vpack.c.bf16 %v243_v9, %v243_v9  ;;  %v268_v19 = vunpack.c.l.b16 %v244_v10  ;;  %v269_v20 = vunpack.c.l.b16 %v245_v11  ;;  %v601_v23 = vld [vmem:[%s976_s1] sm:$0xff]  ;;  %s573_s30 = sshll.u32 %s997_s28, 1 }
  0x26   : > { %322 = vmatpush.bf16.msra.mxu0 %v603_v1  ;;  %608 = vmatpush.bf16.msra.mxu1 %v603_v1  ;;  %v270_v21 = vunpack.c.l.b16 %v246_v12  ;;  %v271_v22 = vunpack.c.l.b16 %v247_v13  ;;  %v272_v24 = vunpack.c.l.b16 %v248_v14  ;;  %v273_v25 = vunpack.c.l.b16 %v249_v16  ;;  %s574_s4 = sshll.u32 %s995_s16, 5 }
  0x27   : > { %609 = vmatpush.bf16.msra.mxu2 %v603_v1  ;;  %610 = vmatpush.bf16.msra.mxu3 %v603_v1  ;;  %v274_v26 = vunpack.c.l.b16 %v250_v17  ;;  %v275_v27 = vunpack.c.l.b16 %v251_v18  ;;  %v276_v28 = vpack.c.b16 %v269_v20, %v268_v19  ;;  %s227_s6 = sadd.s32 %s574_s4, %s573_s30 }
  0x28   : > { %v277_v29 = vpack.c.b16 %v271_v22, %v270_v21  ;;  %v278_v30 = vpack.c.b16 %v273_v25, %v272_v24  ;;  %s575_s7 = sshll.u32 %s227_s6, 2 }
  0x29   : > { %v279_v31 = vpack.c.b16 %v275_v27, %v274_v26  ;;  %s229_s8 = scalar_lea.vmem %s977_s2, %s575_s7 }
  0x2a   : > { %323 = vmatpush.bf16.msra.mxu0 %v602_v15  ;;  %611 = vmatpush.bf16.msra.mxu1 %v602_v15 }
  0x2b   : > { %612 = vmatpush.bf16.msra.mxu2 %v602_v15  ;;  %613 = vmatpush.bf16.msra.mxu3 %v602_v15 }
  0x2e   : > { %324 = vmatpush.bf16.msra.mxu0 %v601_v23  ;;  %614 = vmatpush.bf16.msra.mxu1 %v601_v23 }
  0x2f   : > { %615 = vmatpush.bf16.msra.mxu2 %v601_v23  ;;  %616 = vmatpush.bf16.msra.mxu3 %v601_v23 }
  0x31   : > { %593 = vmatmul.msk.bf16.vlgmr.msra.gmra.mxu0 %vm304_vm0, %v276_v28  ;;  %594 = vmatmul.msk.bf16.vlgmr.msra.gmra.mxu1 %vm304_vm0, %v277_v29 }
  0x32   : > { %595 = vmatmul.msk.bf16.vlgmr.msra.gmra.mxu2 %vm304_vm0, %v278_v30  ;;  %596 = vmatmul.msk.bf16.vlgmr.msra.gmra.mxu3 %vm304_vm0, %v279_v31 }
  0xae   : > { %v326_v32 = vpop.f32.mrf.mxu0  ;;  %v331_v33 = vpop.f32.mrf.mxu1 }
  0xaf   : > { %v346_v34 = vpack.c.bf16 %v326_v32, %v326_v32  ;;  %v348_v35 = vpack.c.bf16 %v331_v33, %v331_v33 }
  0xb1   : > { %355 = vst.msk [vmem:[%s229_s8] sm:$0xf] %vm354_vm1, %v346_v34 }
  0xb2   : > { %357 = vst.msk [vmem:[%s229_s8 + $0x8] sm:$0xf] %vm354_vm1, %v348_v35 }
  0xb5   : > { %v336_v36 = vpop.f32.mrf.mxu2  ;;  %v341_v37 = vpop.f32.mrf.mxu3 }
  0xb6   : > { %v350_v38 = vpack.c.bf16 %v336_v36, %v336_v36  ;;  %v352_v39 = vpack.c.bf16 %v341_v37, %v341_v37  ;;  %v328_v40 = vpop.f32.mrf.mxu0  ;;  %v333_v41 = vpop.f32.mrf.mxu1 }
  0xb7   : > { %v347_v42 = vpack.c.bf16 %v328_v40, %v328_v40  ;;  %v349_v43 = vpack.c.bf16 %v333_v41, %v333_v41 }
  0xb8   : > { %359 = vst.msk [vmem:[%s229_s8 + $0x10] sm:$0xf] %vm354_vm1, %v350_v38 }
  0xb9   : > { %361 = vst.msk [vmem:[%s229_s8 + $0x18] sm:$0xf] %vm354_vm1, %v352_v39 }
  0xba   : > { %356 = vst.msk [vmem:[%s229_s8 + $0x4] sm:$0xf] %vm354_vm1, %v347_v42 }
  0xbb   : > { %358 = vst.msk [vmem:[%s229_s8 + $0xc] sm:$0xf] %vm354_vm1, %v349_v43 }
  0xbd   : > { %v338_v44 = vpop.f32.mrf.mxu2  ;;  %v343_v45 = vpop.f32.mrf.mxu3  ;;  %366 = sbr.rel (%p597_p2) target bundleno = 196 (0xc4), region = 36 }
  0xbe   : > { %v351_v46 = vpack.c.bf16 %v338_v44, %v338_v44  ;;  %v353_v47 = vpack.c.bf16 %v343_v45, %v343_v45 }
  0xc0   : > { %360 = vst.msk [vmem:[%s229_s8 + $0x14] sm:$0xf] %vm354_vm1, %v351_v46 }
  0xc1   : > { %362 = vst.msk [vmem:[%s229_s8 + $0x1c] sm:$0xf] %vm354_vm1, %v353_v47 }
  0xc2   : > { %vm367_vm2 = vcmask 123904   ;;  %v791_v48 = vmov 0.0  }
  0xc3   : > { %368 = vst.msk [vmem:[%s904_s9] sm:$0x3] %vm367_vm2, %v791_v48 }
  0xc4 PF: > { %vm370_vm3 = vcmask 130048   ;;  %v392_v49 = vmul.f32 %v326_v32, %v326_v32  ;;  %v393_v50 = vmul.f32 %v328_v40, %v328_v40  ;;  %v394_v54 = vmul.f32 %v331_v33, %v331_v33 }
  0xc5   : > { %v371_v51 = vsel %vm370_vm3, %v326_v32, 0.0  ;;  %v372_v52 = vsel %vm370_vm3, %v328_v40, 0.0  ;;  %v374_v53 = vsel %vm370_vm3, %v331_v33, 0.0  ;;  %v376_v56 = vsel %vm370_vm3, %v333_v41, 0.0 }
  0xc6   : > { %v373_v55 = vadd.f32 %v372_v52, %v371_v51  ;;  %v395_v57 = vmul.f32 %v333_v41, %v333_v41  ;;  %v400_v59 = vsel %vm370_vm3, %v392_v49, 0.0  ;;  %v378_v60 = vsel %vm370_vm3, %v336_v36, 0.0 }
  0xc7   : > { %v396_v61 = vmul.f32 %v336_v36, %v336_v36  ;;  %v401_v62 = vsel %vm370_vm3, %v393_v50, 0.0  ;;  %v403_v63 = vsel %vm370_vm3, %v394_v54, 0.0  ;;  %v380_v2 = vsel %vm370_vm3, %v338_v44, 0.0 }
  0xc8   : > { %v375_v58 = vadd.f32 %v374_v53, %v373_v55  ;;  %v402_v1 = vadd.f32 %v401_v62, %v400_v59  ;;  %v397_v3 = vmul.f32 %v338_v44, %v338_v44  ;;  %v405_v4 = vsel %vm370_vm3, %v395_v57, 0.0 }
  0xc9   : > { %v382_v7 = vsel %vm370_vm3, %v341_v37, 0.0  ;;  %v398_v8 = vmul.f32 %v341_v37, %v341_v37  ;;  %v407_v9 = vsel %vm370_vm3, %v396_v61, 0.0  ;;  %v384_v12 = vsel %vm370_vm3, %v343_v45, 0.0 }
  0xca   : > { %v377_v0 = vadd.f32 %v376_v56, %v375_v58  ;;  %v404_v6 = vadd.f32 %v403_v63, %v402_v1  ;;  %v399_v13 = vmul.f32 %v343_v45, %v343_v45  ;;  %v409_v14 = vsel %vm370_vm3, %v397_v3, 0.0  ;;  %v369_v34 = vld [vmem:[%s904_s9] sm:$0x3] }
  0xcb   : > { %v411_v17 = vsel %vm370_vm3, %v398_v8, 0.0  ;;  %vm421_vm4 = vcmask 1040384   ;;  %vm424_vm5 = vcmask 123904  }
  0xcc   : > { %v379_v5 = vadd.f32 %v378_v60, %v377_v0  ;;  %v406_v11 = vadd.f32 %v405_v4, %v404_v6  ;;  %v413_v20 = vsel %vm370_vm3, %v399_v13, 0.0 }
  0xce   : > { %v381_v10 = vadd.f32 %v380_v2, %v379_v5  ;;  %v408_v16 = vadd.f32 %v407_v9, %v406_v11 }
  0xd0   : > { %v383_v15 = vadd.f32 %v382_v7, %v381_v10  ;;  %v410_v19 = vadd.f32 %v409_v14, %v408_v16 }
  0xd2   : > { %v385_v18 = vadd.f32 %v384_v12, %v383_v15  ;;  %v412_v22 = vadd.f32 %v411_v17, %v410_v19 }
  0xd4   : > { %v386_v21 = vrot.slane %v385_v18, 4  ;;  %v414_v24 = vadd.f32 %v413_v20, %v412_v22 }
  0xd6   : > { %v387_v23 = vadd.f32 %v386_v21, %v385_v18  ;;  %v415_v26 = vrot.slane %v414_v24, 4 }
  0xd8   : > { %v388_v25 = vrot.slane %v387_v23, 2  ;;  %v416_v28 = vadd.f32 %v415_v26, %v414_v24 }
  0xda   : > { %v389_v27 = vadd.f32 %v388_v25, %v387_v23  ;;  %v417_v30 = vrot.slane %v416_v28, 2 }
  0xdc   : > { %v390_v29 = vrot.slane %v389_v27, 1  ;;  %v418_v31 = vadd.f32 %v417_v30, %v416_v28 }
  0xde   : > { %v391_v32 = vadd.f32 %v390_v29, %v389_v27  ;;  %v419_v33 = vrot.slane %v418_v31, 1 }
  0xe0   : > { %v420_v35 = vadd.f32 %v419_v33, %v418_v31 }
  0xe2   : > { %v422_v36 = vsel %vm421_vm4, %v391_v32, %v420_v35 }
  0xe3   : > { %v423_v37 = vadd.f32 %v422_v36, %v369_v34 }
  0xe5   : > { %425 = vst.msk [vmem:[%s904_s9] sm:$0x3] %vm424_vm5, %v423_v37 }
  0xe6 PF: > { %s17_s19 = sadd.s32 1, %s787_s19   ;;  %s981_s12 = smov %s763_s13 }
  0xe7   : > { %p14_p3 = scmp.ge.s32.totalorder %s17_s19, 10   ;;  %s982_s13 = smov %s767_s14 }
  0xe8   : > { %s983_s14 = smov %s879_s5  ;;  %s984_s15 = smov %s779_s17 }
  0xe9   : > { %s985_s16 = smov %s783_s18  ;;  %s986_s17 = smov %s989_s21 }
  0xea   : > { %s987_s18 = smov %s993_s22  ;;  %16 = sbr.rel (!%p14_p3) target bundleno = 5 (0x5), region = 84 }
  0xef   :  { %472 = vsyncpa [#allocation3], 1 }
  0xf0   :  { %474 = vsyncpa [#allocation3 + $0x1], 1 }

// kernel: bottleneck_forward.7
= control target key start
LH: loop header
LB: loop body
LE: loop exit
PB: predicated region body
PF: predicated region fallthrough
CT: control target
= control target key end

     0   :  { %11 = vsyncpa [#allocation3], 0  ;;  %s960_s0 = inlined_call_operand.vmem [shape: f32[2,16,16,64], index: 0, kind: input, shape index: {}]   ;;  %s961_s1 = inlined_call_operand.vmem [shape: bf16[2,16,16,64], index: 1, kind: input, shape index: {}]   ;;  %s962_s2 = inlined_call_operand.vmem [shape: f32[1,64], index: 2, kind: input, shape index: {}]   ;;  %s963_s3 = inlined_call_operand.vmem [shape: f32[1,64], index: 3, kind: input, shape index: {}]   ;;  %s964_s4 = inlined_call_operand.vmem [shape: f32[1,64], index: 4, kind: input, shape index: {}]   ;;  %s965_s5 = inlined_call_operand.vmem [shape: f32[1,64], index: 5, kind: input, shape index: {}]   ;;  %s966_s6 = inlined_call_operand.hbm [shape: f32[2,16,16,64], index: 6, kind: output, shape index: {}]  }
   0x1   :  { %13 = vsyncpa [#allocation3 + $0x1], 0  ;;  %s796_s21 = smov 0   ;;  %s798_s22 = smov 0  }
   0x2   :  { %s800_s23 = smov 0   ;;  %s802_s24 = smov 0  }
   0x3   :  { %s804_s25 = smov 0   ;;  %s806_s26 = smov 0  }
   0x4   :  { %s808_s27 = smov 0   ;;  %s810_s28 = smov 0  }
   0x5 LB: > { %970 = sst [smem:[#allocation5_spill]] %s753_s27  ;;  %s545_s29 = sadd.s32 4294967295, %s757_s28   ;;  %s757_s28 = sphi %s810_s28, %s19_s28   ;;  %s753_s27 = sphi %s808_s27, %s977_s27   ;;  %s749_s26 = sphi %s806_s26, %s982_s26   ;;  %s745_s25 = sphi %s804_s25, %s975_s25   ;;  %s741_s24 = sphi %s802_s24, %s981_s24   ;;  %s737_s23 = sphi %s800_s23, %s980_s23   ;;  %s733_s22 = sphi %s798_s22, %s979_s22   ;;  %s729_s21 = sphi %s796_s21, %s978_s21  }
   0x6   : > { %s546_s30 = sadd.s32 4294967294, %s757_s28   ;;  %s28_s7 = sadd.s32 1, %s749_s26 }
   0x7   : > { %p29_p0 = scmp.ge.s32.totalorder %s28_s7, 4  ;;  %s31_s8 = sadd.s32 1, %s753_s27 }
   0x8   : > { %p190_p1 = scmp.ne.s32.totalorder %s737_s23, %s733_s22  ;;  %p191_p2 = scmp.eq.s32.totalorder %s545_s29, 7 }
   0x9   : > { %s984_s7 = smov (%p29_p0, %s28_s7), 0  ;;  %s986_s8 = smov (!%p29_p0, %s31_s8), %s753_s27 }
   0xa   : > { %971 = sst [smem:[#allocation6_spill]] %s984_s7  ;;  %s176_s9 = ssub.s32 %s749_s26, %s984_s7 }
   0xb   : > { %p847_p3 = por %p191_p2, %p190_p1  ;;  %p33_p4 = scmp.ge.s32.totalorder %s986_s8, 2 }
   0xc   : > { %p196_p5 = scmp.ne.s32.totalorder %s733_s22, %s729_s21  ;;  %p197_p6 = scmp.eq.s32.totalorder %s546_s30, 7 }
   0xd   : > { %p549_p7 = scmp.ge.s32.totalorder %s757_s28, 1  ;;  %s988_s8 = smov (%p33_p4, %s986_s8), 0 }
   0xe   : > { %973 = sst [smem:[#allocation7_spill]] %s988_s8  ;;  %p856_p8 = por %p197_p6, %p196_p5 }
   0xf   : > { %p255_p9 = scmp.lt.s32.totalorder %s757_s28, 9  ;;  %s175_s12 = ssub.s32 %s753_s27, %s988_s8 }
  0x10   : > { %s180_s13 = sadd.s32 1, %s737_s23  ;;  %s177_s14 = sor.u32 %s176_s9, %s175_s12 }
  0x11   : > { %p256_p10 = pnand %p549_p7, %p255_p9  ;;  %p178_p11 = scmp.eq.s32.totalorder %s177_s14, 0 }
  0x12   : > { %s551_s16 = sshll.u32 (!%p256_p10), %s741_s24, 2  ;;  %p301_p12 = scmp.lt.s32.totalorder (!%p256_p10), %s745_s25, 1 }
  0x13   : > { %s865_s15 = scalar_select %p178_p11, %s737_s23, %s180_s13  }
  0x14   : > { %259 = sbr.rel (%p256_p10) target bundleno = 57 (0x39), region = 44  ;;  %p303_p13 = scmp.lt.s32.totalorder (!%p256_p10), %s551_s16, 15 }
  0x15   : > { %s297_s30 = sand.u32 (!%p256_p10), 1, %s733_s22  }
  0x16   : > { %s421_s27 = scalar_lea.sflag (!%p256_p10), [#allocation3], %s297_s30 }
  0x19   : > { %s302_s17 = scalar_select %p301_p12, %s745_s25, 1  ;;  %v659_v0 = vld [vmem:[%s962_s2] ss:$0 sm:$0xff]  ;;  %vm411_vm0 = vcmask 523264  }
  0x1a   : > { %s990_s16 = smov (!%p303_p13, %s551_s16), 15  ;;  %v660_v3 = vld [vmem:[%s963_s3] ss:$0 sm:$0xff] }
  0x1b   : > { %s553_s18 = sshll.u32 %s302_s17, 5  ;;  %s552_s19 = sshll.u32 %s990_s16, 1  ;;  %v661_v10 = vld [vmem:[%s964_s4] ss:$0 sm:$0xff] }
  0x1c   : > { %s307_s20 = sadd.s32 %s553_s18, %s552_s19  ;;  %v662_v20 = vld [vmem:[%s965_s5] ss:$0 sm:$0xff] }
  0x1d   : > { %s558_s29 = sshll.u32 %s307_s20, 2  ;;  %s554_s14 = sshll.u32 %s307_s20, 3 }
  0x1e   : > { %s320_s9 = scalar_lea.vmem %s961_s1, %s558_s29  ;;  %s885_s7 = scalar_lea.vmem %s960_s0, %s554_s14 }
  0x1f   : > { %v568_v1 = vld [vmem:[%s320_s9] sm:$0xff]   ;;  %v583_v5 = vld [vmem:[%s320_s9 + $0x8] sm:$0xff]   ;;  %v584_v8 = vld [vmem:[%s320_s9 + $0x10] sm:$0xff]   ;;  %s566_s20 = sshll.u32 %s741_s24, 3  ;;  %s562_s29 = sshll.u32 %s745_s25, 5 }
  0x20   : > { %v569_v2 = vunpack.c.l.bf16 %v568_v1  ;;  %v570_v4 = vunpack.c.h.bf16 %v568_v1  ;;  %v573_v6 = vunpack.c.l.bf16 %v583_v5  ;;  %v574_v7 = vunpack.c.h.bf16 %v583_v5  ;;  %v585_v14 = vld [vmem:[%s320_s9 + $0x18] sm:$0xff]   ;;  %v387_v32 = vld [vmem:[%s885_s7] sm:$0xff]  ;;  %v388_v33 = vld [vmem:[%s885_s7 + $0x8] sm:$0xff]  ;;  %s895_s24 = sadd.s32 %s566_s20, %s562_s29  ;;  %s899_s25 = sshll.u32 %s297_s30, 6 }
  0x21   : > { %v577_v12 = vunpack.c.l.bf16 %v584_v8  ;;  %v578_v13 = vunpack.c.h.bf16 %v584_v8  ;;  %v581_v17 = vunpack.c.l.bf16 %v585_v14  ;;  %v582_v18 = vunpack.c.h.bf16 %v585_v14  ;;  %v389_v40 = vld [vmem:[%s885_s7 + $0x10] sm:$0xff]  ;;  %v390_v41 = vld [vmem:[%s885_s7 + $0x18] sm:$0xff]  ;;  %v391_v46 = vld [vmem:[%s885_s7 + $0x20] sm:$0xff]  ;;  %s563_s9 = sshll.u32 %s895_s24, 3  ;;  %s299_s16 = scalar_lea.vmem [#allocation2], %s899_s25 }
  0x22   : > { %v346_v9 = vsub.f32 %v569_v2, %v659_v0  ;;  %v347_v11 = vsub.f32 %v570_v4, %v659_v0  ;;  %v348_v15 = vsub.f32 %v573_v6, %v659_v0  ;;  %v349_v16 = vsub.f32 %v574_v7, %v659_v0  ;;  %v392_v47 = vld [vmem:[%s885_s7 + $0x28] sm:$0xff]  ;;  %v393_v54 = vld [vmem:[%s885_s7 + $0x30] sm:$0xff]  ;;  %v394_v55 = vld [vmem:[%s885_s7 + $0x38] sm:$0xff]  ;;  %s435_s14 = scalar_lea.hbm %s966_s6, %s563_s9  ;;  %s436_s8 = sshll.u32 %s299_s16, 4  ;;  %s437_s8 = int_to_ptr.vmem [resolvable:$true] %s436_s8 }
  0x23   : > { %v350_v22 = vsub.f32 %v577_v12, %v659_v0  ;;  %v351_v23 = vsub.f32 %v578_v13, %v659_v0  ;;  %v352_v26 = vsub.f32 %v581_v17, %v659_v0  ;;  %v353_v27 = vsub.f32 %v582_v18, %v659_v0  ;;  %s438_s17 = sshll.u32 %s435_s14, 4  ;;  %s683_s29 = scalar_lea.hbm %s966_s6, 512  ;;  %s439_s17 = int_to_ptr.hbm [resolvable:$true] %s438_s17 }
  0x24   : > { %v357_v19 = vmul.f32 %v660_v3, %v346_v9  ;;  %v358_v21 = vmul.f32 %v660_v3, %v347_v11  ;;  %v359_v24 = vmul.f32 %v660_v3, %v348_v15  ;;  %v360_v25 = vmul.f32 %v660_v3, %v349_v16  ;;  %s677_s7 = sshra.s32 %s439_s17, 4  ;;  %s678_s7 = int_to_ptr.hbm [resolvable:$true] %s677_s7 }
  0x25   : > { %v361_v30 = vmul.f32 %v660_v3, %v350_v22  ;;  %v362_v31 = vmul.f32 %v660_v3, %v351_v23  ;;  %v363_v36 = vmul.f32 %v660_v3, %v352_v26  ;;  %v364_v37 = vmul.f32 %v660_v3, %v353_v27  ;;  %s679_s18 = scalar_lea.hbm %s678_s7, 64  ;;  %p684_p4 = scmp.lt.s32.totalorder %s678_s7, %s966_s6 }
  0x26   : > { %v368_v28 = vmul.f32 %v661_v10, %v357_v19  ;;  %v369_v29 = vmul.f32 %v661_v10, %v358_v21  ;;  %v370_v34 = vmul.f32 %v661_v10, %v359_v24  ;;  %v371_v35 = vmul.f32 %v661_v10, %v360_v25  ;;  %p680_p0 = scmp.ne.s32.totalorder %s678_s7, %s679_s18  ;;  %p685_p5 = scmp.lt.s32.totalorder %s683_s29, %s679_s18 }
  0x27   : > { %v372_v42 = vmul.f32 %v661_v10, %v361_v30  ;;  %v373_v43 = vmul.f32 %v661_v10, %v362_v31  ;;  %v374_v48 = vmul.f32 %v661_v10, %v363_v36  ;;  %v375_v49 = vmul.f32 %v661_v10, %v364_v37 }
  0x28   : > { %v379_v38 = vadd.f32 %v662_v20, %v368_v28  ;;  %v380_v39 = vadd.f32 %v662_v20, %v369_v29  ;;  %v381_v44 = vadd.f32 %v662_v20, %v370_v34  ;;  %v382_v45 = vadd.f32 %v662_v20, %v371_v35  ;;  %p681_p1 = pnand %p680_p0, %p847_p3  ;;  %p686_p6 = por %p685_p5, %p684_p4 }
  0x29   : > { %v383_v52 = vadd.f32 %v662_v20, %v372_v42  ;;  %v384_v53 = vadd.f32 %v662_v20, %v373_v43  ;;  %v385_v58 = vadd.f32 %v662_v20, %v374_v48  ;;  %v386_v59 = vadd.f32 %v662_v20, %v375_v49 }
  0x2a   : > { %v395_v50 = vadd.f32 %v387_v32, %v379_v38  ;;  %v396_v51 = vadd.f32 %v388_v33, %v380_v39  ;;  %v397_v56 = vadd.f32 %v389_v40, %v381_v44  ;;  %v398_v57 = vadd.f32 %v390_v41, %v382_v45  ;;  %p682_p2 = pneg %p681_p1 }
  0x2b   : > { %v399_v62 = vadd.f32 %v391_v46, %v383_v52  ;;  %v400_v63 = vadd.f32 %v392_v47, %v384_v53  ;;  %v401_v2 = vadd.f32 %v393_v54, %v385_v58  ;;  %v402_v3 = vadd.f32 %v394_v55, %v386_v59 }
  0x2c   : > { %v403_v60 = vmax.f32 %v395_v50, 0.0  ;;  %v404_v61 = vmax.f32 %v396_v51, 0.0  ;;  %v405_v0 = vmax.f32 %v397_v56, 0.0  ;;  %v406_v1 = vmax.f32 %v398_v57, 0.0  ;;  %p687_p7 = pnand %p686_p6, %p682_p2 }
  0x2d   : > { %v407_v4 = vmax.f32 %v399_v62, 0.0  ;;  %v408_v5 = vmax.f32 %v400_v63, 0.0  ;;  %v409_v6 = vmax.f32 %v401_v2, 0.0  ;;  %v410_v7 = vmax.f32 %v402_v3, 0.0 }
  0x2e   : > { %412 = vst.msk [vmem:[%s299_s16] sm:$0xff] %vm411_vm0, %v403_v60 }
  0x2f   : > { %413 = vst.msk [vmem:[%s299_s16 + $0x8] sm:$0xff] %vm411_vm0, %v404_v61 }
  0x30   : > { %414 = vst.msk [vmem:[%s299_s16 + $0x10] sm:$0xff] %vm411_vm0, %v405_v0 }
  0x31   : > { %415 = vst.msk [vmem:[%s299_s16 + $0x18] sm:$0xff] %vm411_vm0, %v406_v1 }
  0x32   : > { %416 = vst.msk [vmem:[%s299_s16 + $0x20] sm:$0xff] %vm411_vm0, %v407_v4 }
  0x33   : > { %417 = vst.msk [vmem:[%s299_s16 + $0x28] sm:$0xff] %vm411_vm0, %v408_v5 }
  0x34   : > { %418 = vst.msk [vmem:[%s299_s16 + $0x30] sm:$0xff] %vm411_vm0, %v409_v6 }
  0x35   : > { %419 = vst.msk [vmem:[%s299_s16 + $0x38] sm:$0xff] %vm411_vm0, %v410_v7 }
  0x36   : > { %690 = shalt.err (!%p687_p7)
}
  0x37   : > { %s759_s30 = smov 128   ;;  %s760_s9 = smov 8  }
  0x38   : > { %586 = dma.vmem_to_hbm [thread:$0]  (%p847_p3), %s437_s8, 1024, %s439_s17, %s421_s27, %s759_s30, %s759_s30, %s760_s9  }
  0x39 PF: > { %p592_p9 = scmp.ge.s32.totalorder %s757_s28, 2  ;;  %s453_s12 = sand.u32 1, %s729_s21  }
  0x3a   : > { %s454_s13 = scalar_lea.sflag [#allocation3], %s453_s12 }
  0x3b   : > { %p589_p10 = pnand %p592_p9, %p856_p8 }
  0x3d   : > { %p590_p11 = pneg %p589_p10 }
  0x3f   : > { %724 = dma.done.wait (%p590_p11), %s454_s13, 1024  }
  0x40   : > { %726 = vsyncadd (%p590_p11), %s454_s13, 4294966272  ;;  %s19_s28 = sadd.s32 1, %s757_s28   ;;  %s975_s25 = sld [smem:[#allocation5_spill]] }
  0x41   : > { %p16_p12 = scmp.ge.s32.totalorder %s19_s28, 10   ;;  %s976_s10 = sld [smem:[#allocation6_spill]] }
  0x42   : > { %s977_s27 = sld [smem:[#allocation7_spill]]  ;;  %s978_s21 = smov %s733_s22 }
  0x43   : > { %s979_s22 = smov %s737_s23  ;;  %s980_s23 = smov %s865_s15 }
  0x44   : > { %s981_s24 = smov %s749_s26  ;;  %18 = sbr.rel (!%p16_p12) target bundleno = 5 (0x5), region = 82 }
  0x47   : > { %s982_s26 = smov %s976_s10 }
  0x49   :  { %460 = vsyncpa [#allocation3], 1 }
  0x4a   :  { %462 = vsyncpa [#allocation3 + $0x1], 1 }

// kernel: bottleneck_forward.5
= control target key start
LH: loop header
LB: loop body
LE: loop exit
PB: predicated region body
PF: predicated region fallthrough
CT: control target
= control target key end

     0   :  { %s1674_s27 = smov 0   ;;  %s1676_s28 = smov 0   ;;  %s2070_s0 = inlined_call_operand.vmem [shape: bf16[2,16,16,16], index: 0, kind: input, shape index: {}, may-alias: {0,1}]   ;;  %s2071_s1 = inlined_call_operand.vmem [shape: bf16[2,16,16,16], index: 1, kind: input, shape index: {}, may-alias: {0,1}]   ;;  %s2072_s2 = inlined_call_operand.vmem [shape: bf16[9,16,16], index: 2, kind: input, shape index: {}]   ;;  %s2073_s3 = inlined_call_operand.vmem [shape: f32[1,16], index: 3, kind: input, shape index: {}]   ;;  %s2074_s4 = inlined_call_operand.vmem [shape: f32[1,16], index: 4, kind: input, shape index: {}]   ;;  %s2075_s5 = inlined_call_operand.vmem [shape: f32[1,16], index: 5, kind: input, shape index: {}]   ;;  %s2076_s6 = inlined_call_operand.vmem [shape: f32[1,16], index: 6, kind: input, shape index: {}]   ;;  %s2077_s7 = inlined_call_operand.vmem [shape: bf16[2,16,16,16], index: 7, kind: output, shape index: {0}]   ;;  %s2078_s8 = inlined_call_operand.vmem [shape: f32[2,2,16], index: 8, kind: output, shape index: {1}]  }
   0x1   :  { %s1678_s29 = smov 0   ;;  %s1680_s30 = smov 0  }
   0x2   :  { %s1682_s9 = smov 0  }
   0x3 LB: > { %s28_s10 = sadd.s32 1, %s1616_s29  ;;  %s31_s11 = sadd.s32 1, %s1620_s30  ;;  %s1624_s9 = sphi %s1682_s9, %s19_s9   ;;  %s1620_s30 = sphi %s1680_s30, %s2090_s30   ;;  %s1616_s29 = sphi %s1678_s29, %s2089_s29   ;;  %s1612_s28 = sphi %s1676_s28, %s2088_s28   ;;  %s1608_s27 = sphi %s1674_s27, %s2087_s27  }
   0x4   : > { %p29_p0 = scmp.ge.s32.totalorder %s28_s10, 4  ;;  %p1379_p1 = scmp.ge.s32.totalorder %s1624_s9, 1 }
   0x5   : > { %p263_p2 = scmp.lt.s32.totalorder %s1624_s9, 9 }
   0x6   : > { %s2092_s10 = smov (%p29_p0, %s28_s10), 0  ;;  %s2094_s11 = smov (!%p29_p0, %s31_s11), %s1620_s30 }
   0x7   : > { %2079 = sst [smem:[#allocation8_spill]] %s2092_s10  ;;  %p264_p3 = pnand %p1379_p1, %p263_p2 }
   0x8   : > { %p33_p4 = scmp.ge.s32.totalorder %s2094_s11, 2  ;;  %s1380_s12 = sshll.u32 (!%p264_p3), %s1608_s27, 2 }
   0x9   : > { %267 = sbr.rel (%p264_p3) target bundleno = 395 (0x18b), region = 44  ;;  %p310_p5 = scmp.lt.s32.totalorder (!%p264_p3), %s1612_s28, 1 }
   0xa   : > { %s2096_s11 = smov (%p33_p4, %s2094_s11), 0  ;;  %p312_p6 = scmp.lt.s32.totalorder (!%p264_p3), %s1380_s12, 15 }
   0xb   : > { %2080 = sst [smem:[#allocation9_spill]] %s2096_s11  ;;  %p336_p7 = scmp.gt.s32.totalorder (!%p264_p3), %s1608_s27, 0 }
   0xc   : > { %p1389_p8 = scmp.le.s32.totalorder (!%p264_p3), %s1608_s27, 0 }
   0xe   : > { %s311_s13 = scalar_select %p310_p5, %s1612_s28, 1 }
   0xf   : > { %s313_s14 = scalar_select %p312_p6, %s1380_s12, 15 }
  0x10   : > { %s1382_s15 = sshll.u32 %s311_s13, 5  ;;  %s1388_s16 = sshll.u32 %s311_s13, 1 }
  0x11   : > { %s1381_s17 = sshll.u32 %s313_s14, 1  ;;  %s1715_s20 = scalar_lea.vmem %s2078_s8, %s1388_s16 }
  0x12   : > { %s316_s21 = sadd.s32 %s1382_s15, %s1381_s17  ;;  %339 = sbr.rel (%p1389_p8) target bundleno = 30 (0x1e), region = 48 }
  0x13   : > { %s1383_s22 = sshll.u32 %s316_s21, 2  ;;  %s1391_s13 = sadd.s32 (!%p1389_p8), 4294967295, %s1380_s12 }
  0x14   : > { %s1720_s25 = scalar_lea.vmem %s2070_s0, %s1383_s22  ;;  %s1725_s10 = scalar_lea.vmem %s2077_s7, %s1383_s22 }
  0x15   : > { %s1393_s14 = sshll.u32 (!%p1389_p8), %s1612_s28, 5  ;;  %s1392_s16 = sshll.u32 (!%p1389_p8), %s1391_s13, 1 }
  0x16   : > { %s344_s18 = sadd.s32 (!%p1389_p8), %s1393_s14, %s1392_s16 }
  0x17   : > { %s1394_s15 = sshll.u32 %s344_s18, 2 }
  0x18   : > { %s346_s21 = scalar_lea.vmem %s2071_s1, %s1394_s15 }
  0x19   : > { %v373_v0 = vld [vmem:[%s346_s21] sm:$0xff] }
  0x1a   : > { %374 = vst [vmem:[#allocation2] sm:$0xff] %v373_v0 }
  0x1b   : > { %380 = vsyncadd [#allocation3], 128 }
  0x1c   : > { %1602 = dma.done.wait [#allocation3], 128 }
  0x1d   : > { %1603 = vsyncadd [#allocation3], 4294967168 }
  0x1e PF: > { %p1395_p9 = scmp.ne.s32.totalorder %s1608_s27, 0 }
  0x20   : > { %389 = sbr.rel (%p1395_p9) target bundleno = 40 (0x28), region = 86 }
  0x25   : > { %vm390_vm0 = vcmask 125952   ;;  %v1626_v1 = vmov 0  }
  0x26   : > { %391 = vst.msk [vmem:[#allocation2] sm:$0xf] %vm390_vm0, %v1626_v1 }
  0x27   : > { %392 = vst.msk [vmem:[#allocation2 + $0x4] sm:$0xf] %vm390_vm0, %v1626_v1 }
  0x28 PF: > { %p393_p10 = scmp.lt.s32.totalorder %s1608_s27, 3  ;;  %p1396_p11 = scmp.ge.s32.totalorder %s1608_s27, 3 }
  0x29   : > { %s1397_s11 = sshll.u32 (!%p1396_p11), %s1608_s27, 3  ;;  %s1398_s12 = sshll.u32 (!%p1396_p11), %s1612_s28, 5 }
  0x2a   : > { %396 = sbr.rel (%p1396_p11) target bundleno = 52 (0x34), region = 90  ;;  %s1308_s22 = sadd.s32 (!%p1396_p11), %s1398_s12, %s1397_s11 }
  0x2b   : > { %s1399_s23 = sshll.u32 (!%p1396_p11), %s1308_s22, 2 }
  0x2c   : > { %s1310_s13 = scalar_lea.vmem (!%p1396_p11), %s2071_s1, %s1399_s23 }
  0x2f   : > { %v1400_v2 = vld [vmem:[%s1310_s13 + $0x20] sm:$0xff] }
  0x30   : > { %433 = vst [vmem:[#allocation2 + $0x8] sm:$0xff] %v1400_v2 }
  0x31   : > { %439 = vsyncadd [#allocation3 + $0x1], 128 }
  0x32   : > { %1604 = dma.done.wait [#allocation3 + $0x1], 128 }
  0x33   : > { %1605 = vsyncadd [#allocation3 + $0x1], 4294967168 }
  0x34 PF: > { %p1401_p12 = scmp.ne.s32.totalorder %s1608_s27, 3 }
  0x36   : > { %448 = sbr.rel (%p1401_p12) target bundleno = 62 (0x3e), region = 128 }
  0x3b   : > { %vm450_vm1 = vcmask 125952   ;;  %v1627_v3 = vmov 0  }
  0x3c   : > { %451 = vst.msk [vmem:[#allocation2 + $0x8] sm:$0xf] %vm450_vm1, %v1627_v3 }
  0x3d   : > { %452 = vst.msk [vmem:[#allocation2 + $0xc] sm:$0xf] %vm450_vm1, %v1627_v3 }
  0x3e PF: > { %v1496_v4 = vld [vmem:[%s2072_s2 + $0x8] sm:$0xff]  ;;  %v1505_v5 = vld [vmem:[%s1720_s25] sm:$0xff]   ;;  %v1529_v12 = vld [vmem:[%s1720_s25 + $0x10] sm:$0xff]   ;;  %vm700_vm2 = vcmask 130048   ;;  %s565_s18 = scalar_select %p336_p7, 1, 0 }
  0x3f   : > { %1532 = vmatpush.bf16.msra.mxu1 %v1496_v4  ;;  %1533 = vmatpush.bf16.msra.mxu2 %v1496_v4  ;;  %v1506_v6 = vunpack.c.l.bf16 %v1505_v5  ;;  %v1507_v7 = vunpack.c.h.bf16 %v1505_v5  ;;  %v1750_v8 = vld [vmem:[%s2073_s3] ss:$0 sm:$0xff]  ;;  %v1528_v11 = vld [vmem:[%s1720_s25 + $0x8] sm:$0xff]   ;;  %v1497_v17 = vld [vmem:[%s2072_s2 + $0x10] sm:$0xff]  ;;  %v1514_v20 = vunpack.c.l.bf16 %v1529_v12  ;;  %v1515_v21 = vunpack.c.h.bf16 %v1529_v12 }
  0x40   : > { %v1755_v9 = vld [vmem:[%s2074_s4] ss:$0 sm:$0xff]  ;;  %1534 = vmatpush.bf16.msra.mxu3 %v1496_v4  ;;  %716 = vmatpush.bf16.msra.mxu0 %v1496_v4  ;;  %v1510_v15 = vunpack.c.l.bf16 %v1528_v11  ;;  %v1511_v16 = vunpack.c.h.bf16 %v1528_v11  ;;  %v1498_v19 = vld [vmem:[%s2072_s2 + $0x18] sm:$0xff]  ;;  %vm653_vm4 = vcmask 1040384   ;;  %vm654_vm5 = vsmask.f32 256 }
  0x41   : > { %v1760_v10 = vld [vmem:[%s2075_s5] ss:$0 sm:$0xff]  ;;  %v476_v13 = vsub.f32 %v1506_v6, %v1750_v8  ;;  %v477_v14 = vsub.f32 %v1507_v7, %v1750_v8  ;;  %v480_v31 = vsub.f32 %v1514_v20, %v1750_v8  ;;  %v481_v32 = vsub.f32 %v1515_v21, %v1750_v8  ;;  %v1501_v21 = vld [vmem:[%s2072_s2 + $0x30] sm:$0xff]  ;;  %vm1838_vm8 = vmand %vm653_vm4, %vm654_vm5 }
  0x42   : > { %v1521_v18 = vld [vmem:[#allocation2] sm:$0xff]   ;;  %v478_v29 = vsub.f32 %v1510_v15, %v1750_v8  ;;  %v479_v30 = vsub.f32 %v1511_v16, %v1750_v8  ;;  %vm680_vm6 = vcmask 1047552   ;;  %vm681_vm7 = vsmask.f32 7424 }
  0x43   : > { %v1522_v22 = vunpack.c.l.bf16 %v1521_v18  ;;  %v1523_v23 = vunpack.c.h.bf16 %v1521_v18  ;;  %v1495_v24 = vld [vmem:[%s2072_s2] sm:$0xff]  ;;  %v487_v26 = vmul.f32 %v1755_v9, %v476_v13  ;;  %v488_v27 = vmul.f32 %v1755_v9, %v477_v14  ;;  %813 = vmatpush.bf16.msrb.mxu2 %v1497_v17  ;;  %v1500_v14 = vld [vmem:[%s2072_s2 + $0x28] sm:$0xff]  ;;  %vm1842_vm9 = vmand %vm680_vm6, %vm681_vm7 }
  0x44   : > { %v1499_v25 = vld [vmem:[%s2072_s2 + $0x20] sm:$0xff]  ;;  %862 = vmatpush.bf16.msrb.mxu3 %v1498_v19  ;;  %v489_v37 = vmul.f32 %v1755_v9, %v478_v29  ;;  %v490_v38 = vmul.f32 %v1755_v9, %v479_v30  ;;  %763 = vmatpush.bf16.msrb.mxu1 %v1495_v24  ;;  %v491_v39 = vmul.f32 %v1755_v9, %v480_v31  ;;  %v566_v18 = vstv %s565_s18 }
  0x45   : > { %v1783_v28 = vld [vmem:[%s2076_s6] ss:$0 sm:$0xff]  ;;  %v541_v33 = vsub.f32 %v1522_v22, %v1750_v8  ;;  %v542_v34 = vsub.f32 %v1523_v23, %v1750_v8  ;;  %v498_v35 = vmul.f32 %v1760_v10, %v487_v26  ;;  %v499_v36 = vmul.f32 %v1760_v10, %v488_v27  ;;  %910 = vmatpush.bf16.msrb.mxu0 %v1499_v25  ;;  %v1502_v25 = vld [vmem:[%s2072_s2 + $0x38] sm:$0xff] }
  0x46   : > { %v492_v40 = vmul.f32 %v1755_v9, %v481_v32  ;;  %v500_v45 = vmul.f32 %v1760_v10, %v489_v37  ;;  %v501_v46 = vmul.f32 %v1760_v10, %v490_v38  ;;  %v502_v47 = vmul.f32 %v1760_v10, %v491_v39  ;;  %v1503_v30 = vld [vmem:[%s2072_s2 + $0x40] sm:$0xff] }
  0x47   : > { %v545_v41 = vmul.f32 %v1755_v9, %v541_v33  ;;  %v546_v42 = vmul.f32 %v1755_v9, %v542_v34  ;;  %v509_v43 = vadd.f32 %v1783_v28, %v498_v35  ;;  %v510_v44 = vadd.f32 %v1783_v28, %v499_v36 }
  0x48   : > { %v503_v48 = vmul.f32 %v1760_v10, %v492_v40  ;;  %v511_v53 = vadd.f32 %v1783_v28, %v500_v45  ;;  %v512_v54 = vadd.f32 %v1783_v28, %v501_v46  ;;  %v513_v55 = vadd.f32 %v1783_v28, %v502_v47  ;;  %v1530_v45 = vld [vmem:[%s1720_s25 + $0x18] sm:$0xff]   ;;  %s570_s25 = scalar_select %p393_p10, 1, 0 }
  0x49   : > { %v549_v49 = vmul.f32 %v1760_v10, %v545_v41  ;;  %v550_v50 = vmul.f32 %v1760_v10, %v546_v42  ;;  %v517_v51 = vmax.f32 %v509_v43, 0.0  ;;  %v518_v52 = vmax.f32 %v510_v44, 0.0 }
  0x4a   : > { %v514_v56 = vadd.f32 %v1783_v28, %v503_v48  ;;  %v519_v61 = vmax.f32 %v511_v53, 0.0  ;;  %v520_v62 = vmax.f32 %v512_v54, 0.0  ;;  %v521_v63 = vmax.f32 %v513_v55, 0.0 }
  0x4b   : > { %v553_v57 = vadd.f32 %v1783_v28, %v549_v49  ;;  %v554_v58 = vadd.f32 %v1783_v28, %v550_v50  ;;  %v525_v59 = vpack.c.bf16 %v517_v51, %v517_v51  ;;  %v526_v60 = vpack.c.bf16 %v518_v52, %v518_v52 }
  0x4c   : > { %v522_v0 = vmax.f32 %v514_v56, 0.0  ;;  %v527_v5 = vpack.c.bf16 %v519_v61, %v519_v61  ;;  %v528_v6 = vpack.c.bf16 %v520_v62, %v520_v62  ;;  %v529_v7 = vpack.c.bf16 %v521_v63, %v521_v63 }
  0x4d   : > { %v557_v1 = vmax.f32 %v553_v57, 0.0  ;;  %v558_v2 = vmax.f32 %v554_v58, 0.0  ;;  %v589_v3 = vunpack.c.l.b16 %v525_v59  ;;  %v590_v4 = vunpack.c.l.b16 %v526_v60 }
  0x4e   : > { %v530_v11 = vpack.c.bf16 %v522_v0, %v522_v0  ;;  %v591_v16 = vunpack.c.l.b16 %v527_v5  ;;  %v592_v17 = vunpack.c.l.b16 %v528_v6  ;;  %v593_v19 = vunpack.c.l.b16 %v529_v7 }
  0x4f   : > { %v561_v12 = vpack.c.bf16 %v557_v1, %v557_v1  ;;  %v562_v13 = vpack.c.bf16 %v558_v2, %v558_v2  ;;  %v600_v15 = vpack.c.b16 %v590_v4, %v589_v3  ;;  %vm567_vm3 = vcmp.eq.s32.totalorder %v566_v18, 1 }
  0x50   : > { %v594_v20 = vunpack.c.l.b16 %v530_v11  ;;  %v1822_v22 = vpack.c.b16 %v592_v17, %v591_v16  ;;  %v1518_v48 = vunpack.c.l.bf16 %v1530_v45  ;;  %v1519_v49 = vunpack.c.h.bf16 %v1530_v45 }
  0x51   : > { %1409 = vmatmul.msk.bf16.vlgmr.msra.gmra.mxu1 %vm700_vm2, %v600_v15  ;;  %v568_v23 = vsel %vm567_vm3, %v561_v12, 0  ;;  %v569_v24 = vsel %vm567_vm3, %v562_v13, 0  ;;  %v613_v32 = vshrl.u32 %v600_v15, 16  ;;  %v616_v38 = vshll.u32 %v600_v15, 16 }
  0x52   : > { %v1827_v26 = vpack.c.b16 %v594_v20, %v593_v19  ;;  %v587_v27 = vunpack.c.l.b16 %v568_v23  ;;  %v588_v29 = vunpack.c.l.b16 %v569_v24  ;;  %959 = vmatpush.bf16.msra.mxu1 %v1500_v14  ;;  %1410 = vmatmul.msk.bf16.vlgmr.msra.gmra.mxu2 %vm700_vm2, %v1822_v22  ;;  %v620_v50 = vshrl.u32 %v1822_v22, 16 }
  0x53   : > { %1008 = vmatpush.bf16.msra.mxu2 %v1501_v21  ;;  %v615_v37 = vrot.slane %v613_v32, 7  ;;  %v482_v51 = vsub.f32 %v1518_v48, %v1750_v8  ;;  %v483_v52 = vsub.f32 %v1519_v49, %v1750_v8  ;;  %v664_v53 = vrot.slane %v616_v38, 1 }
  0x54   : > { %1411 = vmatmul.msk.bf16.vlgmr.msra.gmra.mxu3 %vm700_vm2, %v1827_v26  ;;  %v599_v31 = vpack.c.b16 %v588_v29, %v587_v27  ;;  %v622_v54 = vrot.slane %v620_v50, 7  ;;  %v623_v55 = vshll.u32 %v1822_v22, 16  ;;  %v627_v2 = vshrl.u32 %v1827_v26, 16 }
  0x55   : > { %1056 = vmatpush.bf16.msra.mxu3 %v1502_v25  ;;  %v618_v43 = vor.u32 %v616_v38, %v615_v37  ;;  %v493_v56 = vmul.f32 %v1755_v9, %v482_v51  ;;  %v494_v57 = vmul.f32 %v1755_v9, %v483_v52  ;;  %v665_v58 = vor.u32 %v664_v53, %v613_v32 }
  0x56   : > { %v606_v33 = vshrl.u32 %v599_v31, 16  ;;  %1408 = vmatmul.msk.bf16.vlgmr.msra.gmra.mxu0 %vm700_vm2, %v599_v31  ;;  %v609_v34 = vshll.u32 %v599_v31, 16  ;;  %v625_v59 = vor.u32 %v623_v55, %v622_v54  ;;  %v666_v5 = vrot.slane %v623_v55, 1  ;;  %v1531_v31 = vld [vmem:[#allocation2 + $0x8] sm:$0xff]  }
  0x57   : > { %1105 = vmatpush.bf16.msra.mxu0 %v1503_v30  ;;  %v657_v47 = vsel %vm1838_vm8, 0, %v618_v43  ;;  %v504_v60 = vmul.f32 %v1760_v10, %v493_v56  ;;  %v505_v61 = vmul.f32 %v1760_v10, %v494_v57  ;;  %v684_v62 = vsel %vm1842_vm9, %v665_v58, 0 }
  0x58   : > { %v608_v35 = vrot.slane %v606_v33, 7  ;;  %v662_v36 = vrot.slane %v609_v34, 1  ;;  %v658_v63 = vsel %vm1838_vm8, 0, %v625_v59  ;;  %v629_v6 = vrot.slane %v627_v2, 7 }
  0x59   : > { %v515_v0 = vadd.f32 %v1783_v28, %v504_v60  ;;  %v516_v1 = vadd.f32 %v1783_v28, %v505_v61  ;;  %v630_v7 = vshll.u32 %v1827_v26, 16  ;;  %v667_v13 = vor.u32 %v666_v5, %v620_v50 }
  0x5a   : > { %v611_v39 = vor.u32 %v609_v34, %v608_v35  ;;  %v663_v41 = vor.u32 %v662_v36, %v606_v33  ;;  %v1526_v32 = vunpack.c.l.bf16 %v1531_v31  ;;  %v1527_v33 = vunpack.c.h.bf16 %v1531_v31 }
  0x5b   : > { %v523_v3 = vmax.f32 %v515_v0, 0.0  ;;  %v524_v4 = vmax.f32 %v516_v1, 0.0  ;;  %v632_v14 = vor.u32 %v630_v7, %v629_v6  ;;  %v685_v17 = vsel %vm1842_vm9, %v667_v13, 0 }
  0x5c   : > { %v656_v44 = vsel %vm1838_vm8, 0, %v611_v39  ;;  %v683_v46 = vsel %vm1842_vm9, %v663_v41, 0  ;;  %v668_v21 = vrot.slane %v630_v7, 1  ;;  %v543_v34 = vsub.f32 %v1526_v32, %v1750_v8 }
  0x5d   : > { %v531_v11 = vpack.c.bf16 %v523_v3, %v523_v3  ;;  %v532_v12 = vpack.c.bf16 %v524_v4, %v524_v4  ;;  %v659_v18 = vsel %vm1838_vm8, 0, %v632_v14  ;;  %v544_v35 = vsub.f32 %v1527_v33, %v1750_v8 }
  0x5e   : > { %v669_v25 = vor.u32 %v668_v21, %v627_v2  ;;  %v547_v36 = vmul.f32 %v1755_v9, %v543_v34  ;;  %vm1143_vm11 = vcmask 125952  }
  0x5f   : > { %v596_v16 = vunpack.c.l.b16 %v532_v12  ;;  %v548_v37 = vmul.f32 %v1755_v9, %v544_v35 }
  0x60   : > { %v686_v29 = vsel %vm1842_vm9, %v669_v25, 0  ;;  %v551_v38 = vmul.f32 %v1760_v10, %v547_v36 }
  0x61   : > { %1416 = vmatmul.msk.bf16.vlgmr.msrb.gmra.mxu1 %vm700_vm2, %v656_v44  ;;  %v552_v39 = vmul.f32 %v1760_v10, %v548_v37  ;;  %v571_v44 = vstv %s570_s25 }
  0x62   : > { %1426 = vmatmul.msk.bf16.vlgmr.msrb.gmra.mxu2 %vm700_vm2, %v683_v46  ;;  %v555_v41 = vadd.f32 %v1783_v28, %v551_v38  ;;  %vm572_vm10 = vcmp.eq.s32.totalorder %v571_v44, 1 }
  0x63   : > { %v556_v43 = vadd.f32 %v1783_v28, %v552_v39 }
  0x64   : > { %1436 = vmatmul.msk.bf16.vlgmr.msrb.gmra.mxu3 %vm700_vm2, %v657_v47  ;;  %v559_v8 = vmax.f32 %v555_v41, 0.0 }
  0x66   : > { %1446 = vmatmul.msk.bf16.vlgmr.msrb.gmra.mxu0 %vm700_vm2, %v600_v15  ;;  %v595_v15 = vunpack.c.l.b16 %v531_v11  ;;  %v563_v9 = vpack.c.bf16 %v559_v8, %v559_v8 }
  0x68   : > { %v603_v19 = vpack.c.b16 %v596_v16, %v595_v15  ;;  %v573_v10 = vsel %vm572_vm10, %v563_v9, 0 }
  0x6a   : > { %v634_v20 = vshrl.u32 %v603_v19, 16  ;;  %v637_v24 = vshll.u32 %v603_v19, 16 }
  0x6c   : > { %v636_v23 = vrot.slane %v634_v20, 7  ;;  %v670_v28 = vrot.slane %v637_v24, 1 }
  0x6e   : > { %v639_v27 = vor.u32 %v637_v24, %v636_v23  ;;  %v671_v49 = vor.u32 %v670_v28, %v634_v20 }
  0x70   : > { %v660_v30 = vsel %vm1838_vm8, 0, %v639_v27  ;;  %v687_v51 = vsel %vm1842_vm9, %v671_v49, 0 }
  0x71   : > { %1417 = vmatmul.msk.bf16.gmra.mxu1 %vm700_vm2, %v657_v47  ;;  %v597_v47 = vunpack.c.l.b16 %v573_v10 }
  0x72   : > { %1427 = vmatmul.msk.bf16.gmra.mxu2 %vm700_vm2, %v684_v62 }
  0x74   : > { %1437 = vmatmul.msk.bf16.gmra.mxu3 %vm700_vm2, %v658_v63 }
  0x76   : > { %1447 = vmatmul.msk.bf16.gmra.mxu0 %vm700_vm2, %v1822_v22 }
  0x81   : > { %1418 = vmatmul.msk.bf16.gmra.mxu1 %vm700_vm2, %v658_v63 }
  0x82   : > { %1428 = vmatmul.msk.bf16.gmra.mxu2 %vm700_vm2, %v685_v17 }
  0x84   : > { %1438 = vmatmul.msk.bf16.gmra.mxu3 %vm700_vm2, %v659_v18 }
  0x86   : > { %1448 = vmatmul.msk.bf16.gmra.mxu0 %vm700_vm2, %v1827_v26 }
  0x91   : > { %1419 = vmatmul.msk.bf16.gmra.mxu1 %vm700_vm2, %v659_v18 }
  0x92   : > { %1429 = vmatmul.msk.bf16.gmra.mxu2 %vm700_vm2, %v686_v29 }
  0x94   : > { %1439 = vmatmul.msk.bf16.gmra.mxu3 %vm700_vm2, %v660_v30 }
  0x96   : > { %1449 = vmatmul.msk.bf16.gmra.mxu0 %vm700_vm2, %v603_v19 }
  0xa1   : > { %1456 = vmatmul.msk.bf16.vlgmr.msra.gmra.mxu1 %vm700_vm2, %v684_v62 }
  0xa2   : > { %1466 = vmatmul.msk.bf16.vlgmr.msra.gmra.mxu2 %vm700_vm2, %v658_v63 }
  0xa4   : > { %1476 = vmatmul.msk.bf16.vlgmr.msra.gmra.mxu3 %vm700_vm2, %v1822_v22  ;;  %v560_v22 = vmax.f32 %v556_v43, 0.0 }
  0xa6   : > { %1486 = vmatmul.msk.bf16.vlgmr.msra.gmra.mxu0 %vm700_vm2, %v685_v17  ;;  %v564_v45 = vpack.c.bf16 %v560_v22, %v560_v22 }
  0xa8   : > { %v574_v46 = vsel %vm572_vm10, %v564_v45, 0 }
  0xa9   : > { %v598_v48 = vunpack.c.l.b16 %v574_v46 }
  0xab   : > { %v604_v50 = vpack.c.b16 %v598_v48, %v597_v47 }
  0xad   : > { %v644_v52 = vshll.u32 %v604_v50, 16 }
  0xaf   : > { %v672_v54 = vrot.slane %v644_v52, 1 }
  0xb1   : > { %1457 = vmatmul.msk.bf16.gmra.mxu1 %vm700_vm2, %v685_v17 }
  0xb2   : > { %1467 = vmatmul.msk.bf16.gmra.mxu2 %vm700_vm2, %v659_v18 }
  0xb4   : > { %1477 = vmatmul.msk.bf16.gmra.mxu3 %vm700_vm2, %v1827_v26  ;;  %v641_v26 = vshrl.u32 %v604_v50, 16 }
  0xb6   : > { %1487 = vmatmul.msk.bf16.gmra.mxu0 %vm700_vm2, %v686_v29  ;;  %v643_v53 = vrot.slane %v641_v26, 7  ;;  %v673_v57 = vor.u32 %v672_v54, %v641_v26 }
  0xb8   : > { %v646_v55 = vor.u32 %v644_v52, %v643_v53  ;;  %v688_v60 = vsel %vm1842_vm9, %v673_v57, 0 }
  0xba   : > { %v661_v58 = vsel %vm1838_vm8, 0, %v646_v55 }
  0xc1   : > { %1458 = vmatmul.msk.bf16.gmra.mxu1 %vm700_vm2, %v686_v29 }
  0xc2   : > { %1468 = vmatmul.msk.bf16.gmra.mxu2 %vm700_vm2, %v660_v30 }
  0xc4   : > { %1478 = vmatmul.msk.bf16.gmra.mxu3 %vm700_vm2, %v603_v19 }
  0xc6   : > { %1488 = vmatmul.msk.bf16.gmra.mxu0 %vm700_vm2, %v687_v51 }
  0xce   : > { %v723_v56 = vpop.f32.mrf.mxu1 }
  0xd1   : > { %1459 = vmatmul.msk.bf16.gmra.mxu1 %vm700_vm2, %v687_v51 }
  0xd2   : > { %1469 = vmatmul.msk.bf16.gmra.mxu2 %vm700_vm2, %v661_v58 }
  0xd3   : > { %v718_v59 = vpop.f32.mrf.mxu0 }
  0xd4   : > { %1479 = vmatmul.msk.bf16.gmra.mxu3 %vm700_vm2, %v604_v50 }
  0xd5   : > { %v1929_v61 = vpop.f32.mrf.mxu2 }
  0xd6   : > { %1489 = vmatmul.msk.bf16.gmra.mxu0 %vm700_vm2, %v688_v60  ;;  %v1931_v62 = vpop.f32.mrf.mxu1 }
  0xd7   : > { %v1933_v63 = vpop.f32.mrf.mxu3 }
  0xdb   : > { %v720_v40 = vpop.f32.mrf.mxu0 }
  0xdd   : > { %v1935_v0 = vpop.f32.mrf.mxu2 }
  0xde   : > { %v765_v1 = vpop.f32.mrf.mxu1 }
  0xdf   : > { %v1937_v2 = vpop.f32.mrf.mxu3  ;;  %v766_v36 = vadd.f32 %v765_v1, %v718_v59 }
  0xe3   : > { %v912_v3 = vpop.f32.mrf.mxu0 }
  0xe5   : > { %v815_v4 = vpop.f32.mrf.mxu2 }
  0xe6   : > { %v767_v42 = vpop.f32.mrf.mxu1  ;;  %v835_v37 = vadd.f32 %v815_v4, %v766_v36 }
  0xe7   : > { %v864_v5 = vpop.f32.mrf.mxu3  ;;  %v768_v22 = vadd.f32 %v767_v42, %v720_v40 }
  0xe8   : > { %v884_v43 = vadd.f32 %v864_v5, %v835_v37 }
  0xea   : > { %v932_v9 = vadd.f32 %v912_v3, %v884_v43 }
  0xeb   : > { %v914_v6 = vpop.f32.mrf.mxu0 }
  0xed   : > { %v817_v7 = vpop.f32.mrf.mxu2 }
  0xee   : > { %v770_v11 = vpop.f32.mrf.mxu1  ;;  %v836_v44 = vadd.f32 %v817_v7, %v768_v22 }
  0xef   : > { %v866_v12 = vpop.f32.mrf.mxu3  ;;  %v771_v50 = vadd.f32 %v770_v11, %v723_v56 }
  0xf0   : > { %v885_v47 = vadd.f32 %v866_v12, %v836_v44 }
  0xf2   : > { %v933_v53 = vadd.f32 %v914_v6, %v885_v47 }
  0xf3   : > { %v917_v13 = vpop.f32.mrf.mxu0 }
  0xf5   : > { %v820_v14 = vpop.f32.mrf.mxu2 }
  0xf6   : > { %v772_v15 = vpop.f32.mrf.mxu1  ;;  %v837_v26 = vadd.f32 %v820_v14, %v771_v50 }
  0xf7   : > { %v869_v16 = vpop.f32.mrf.mxu3  ;;  %v773_v56 = vadd.f32 %v772_v15, %v1931_v62 }
  0xf8   : > { %v886_v60 = vadd.f32 %v869_v16, %v837_v26 }
  0xfa   : > { %v934_v5 = vadd.f32 %v917_v13, %v886_v60 }
  0xfb   : > { %v1939_v17 = vpop.f32.mrf.mxu0 }
  0xfd   : > { %v822_v18 = vpop.f32.mrf.mxu2 }
  0xfe   : > { %v775_v19 = vpop.f32.mrf.mxu1  ;;  %v838_v4 = vadd.f32 %v822_v18, %v773_v56 }
  0xff   : > { %v871_v20 = vpop.f32.mrf.mxu3  ;;  %v776_v62 = vadd.f32 %v775_v19, %v1929_v61 }
 0x100   : > { %v887_v16 = vadd.f32 %v871_v20, %v838_v4 }
 0x102   : > { %v935_v13 = vadd.f32 %v1939_v17, %v887_v16 }
 0x103   : > { %v1941_v21 = vpop.f32.mrf.mxu0 }
 0x105   : > { %v825_v23 = vpop.f32.mrf.mxu2 }
 0x106   : > { %v1943_v24 = vpop.f32.mrf.mxu1  ;;  %v839_v18 = vadd.f32 %v825_v23, %v776_v62 }
 0x107   : > { %v1945_v25 = vpop.f32.mrf.mxu3  ;;  %v778_v19 = vadd.f32 %v1943_v24, %v1935_v0 }
 0x108   : > { %v888_v20 = vadd.f32 %v1945_v25, %v839_v18 }
 0x10b   : > { %v1947_v27 = vpop.f32.mrf.mxu0 }
 0x10d   : > { %v1949_v29 = vpop.f32.mrf.mxu2 }
 0x10e   : > { %v1951_v30 = vpop.f32.mrf.mxu1  ;;  %v840_v17 = vadd.f32 %v1949_v29, %v778_v19 }
 0x10f   : > { %v1953_v31 = vpop.f32.mrf.mxu3  ;;  %v781_v29 = vadd.f32 %v1951_v30, %v1933_v63 }
 0x113   : > { %v1955_v32 = vpop.f32.mrf.mxu0 }
 0x115   : > { %v1957_v33 = vpop.f32.mrf.mxu2 }
 0x116   : > { %v1959_v34 = vpop.f32.mrf.mxu1 }
 0x117   : > { %v1961_v35 = vpop.f32.mrf.mxu3  ;;  %v783_v63 = vadd.f32 %v1959_v34, %v1937_v2 }
 0x11b   : > { %v1963_v38 = vpop.f32.mrf.mxu0 }
 0x11d   : > { %v1965_v39 = vpop.f32.mrf.mxu2 }
 0x11e   : > { %v961_v41 = vpop.f32.mrf.mxu1 }
 0x11f   : > { %v1967_v8 = vpop.f32.mrf.mxu3  ;;  %v981_v10 = vadd.f32 %v961_v41, %v932_v9 }
 0x123   : > { %v1107_v45 = vpop.f32.mrf.mxu0 }
 0x125   : > { %v1010_v46 = vpop.f32.mrf.mxu2 }
 0x126   : > { %v963_v28 = vpop.f32.mrf.mxu1  ;;  %v1030_v48 = vadd.f32 %v1010_v46, %v981_v10 }
 0x127   : > { %v1058_v49 = vpop.f32.mrf.mxu3  ;;  %v982_v57 = vadd.f32 %v963_v28, %v933_v53  ;;  %v936_v28 = vadd.f32 %v1941_v21, %v888_v20  ;;  %v841_v21 = vadd.f32 %v1957_v33, %v781_v29  ;;  %v842_v33 = vadd.f32 %v1965_v39, %v783_v63 }
 0x128   : > { %v1078_v51 = vadd.f32 %v1058_v49, %v1030_v48 }
 0x12a   : > { %v1969_v52 = vadd.f32 %v1107_v45, %v1078_v51  ;;  %v889_v51 = vadd.f32 %v1953_v31, %v840_v17  ;;  %v890_v31 = vadd.f32 %v1961_v35, %v841_v21  ;;  %v891_v35 = vadd.f32 %v1967_v8, %v842_v33 }
 0x12b   : > { %v1109_v54 = vpop.f32.mrf.mxu0 }
 0x12c   : > { %v1135_v55 = vpack.c.bf16 %v1969_v52, %v1969_v52  ;;  %v939_v39 = vadd.f32 %v1963_v38, %v891_v35 }
 0x12d   : > { %v1012_v58 = vpop.f32.mrf.mxu2 }
 0x12e   : > { %v966_v59 = vpop.f32.mrf.mxu1  ;;  %1144 = vst.msk [vmem:[%s1725_s10] sm:$0xf] %vm1143_vm11, %v1135_v55  ;;  %v1031_v40 = vadd.f32 %v1012_v58, %v982_v57 }
 0x12f   : > { %v1060_v1 = vpop.f32.mrf.mxu3  ;;  %v983_v11 = vadd.f32 %v966_v59, %v934_v5 }
 0x130   : > { %v1079_v3 = vadd.f32 %v1060_v1, %v1031_v40 }
 0x132   : > { %v1976_v42 = vadd.f32 %v1109_v54, %v1079_v3  ;;  %v937_v54 = vadd.f32 %v1947_v27, %v889_v51  ;;  %v938_v27 = vadd.f32 %v1955_v32, %v890_v31 }
 0x133   : > { %v1112_v6 = vpop.f32.mrf.mxu0 }
 0x134   : > { %v1136_v7 = vpack.c.bf16 %v1976_v42, %v1976_v42 }
 0x135   : > { %v1015_v12 = vpop.f32.mrf.mxu2 }
 0x136   : > { %v968_v14 = vpop.f32.mrf.mxu1  ;;  %1145 = vst.msk [vmem:[%s1725_s10 + $0x4] sm:$0xf] %vm1143_vm11, %v1136_v7  ;;  %v1032_v36 = vadd.f32 %v1015_v12, %v983_v11 }
 0x137   : > { %v1063_v37 = vpop.f32.mrf.mxu3  ;;  %v984_v44 = vadd.f32 %v968_v14, %v935_v13 }
 0x138   : > { %v1080_v15 = vadd.f32 %v1063_v37, %v1032_v36 }
 0x13a   : > { %v1983_v41 = vadd.f32 %v1112_v6, %v1080_v15 }
 0x13b   : > { %v1114_v43 = vpop.f32.mrf.mxu0 }
 0x13c   : > { %v1137_v22 = vpack.c.bf16 %v1983_v41, %v1983_v41 }
 0x13d   : > { %v1017_v9 = vpop.f32.mrf.mxu2 }
 0x13e   : > { %v971_v45 = vpop.f32.mrf.mxu1  ;;  %1146 = vst.msk [vmem:[%s1725_s10 + $0x8] sm:$0xf] %vm1143_vm11, %v1137_v22  ;;  %v1033_v10 = vadd.f32 %v1017_v9, %v984_v44 }
 0x13f   : > { %v1065_v61 = vpop.f32.mrf.mxu3  ;;  %v985_v49 = vadd.f32 %v971_v45, %v936_v28 }
 0x140   : > { %v1081_v23 = vadd.f32 %v1065_v61, %v1033_v10 }
 0x142   : > { %v1994_v46 = vadd.f32 %v1114_v43, %v1081_v23 }
 0x143   : > { %v1117_v47 = vpop.f32.mrf.mxu0 }
 0x144   : > { %v1138_v48 = vpack.c.bf16 %v1994_v46, %v1994_v46 }
 0x145   : > { %v1020_v25 = vpop.f32.mrf.mxu2 }
 0x146   : > { %v973_v50 = vpop.f32.mrf.mxu1  ;;  %1147 = vst.msk [vmem:[%s1725_s10 + $0xc] sm:$0xf] %vm1143_vm11, %v1138_v48  ;;  %v1034_v0 = vadd.f32 %v1020_v25, %v985_v49 }
 0x147   : > { %v1068_v24 = vpop.f32.mrf.mxu3  ;;  %v986_v57 = vadd.f32 %v973_v50, %v937_v54 }
 0x148   : > { %v1082_v26 = vadd.f32 %v1068_v24, %v1034_v0 }
 0x14a   : > { %v1131_v53 = vadd.f32 %v1117_v47, %v1082_v26 }
 0x14b   : > { %v1119_v58 = vpop.f32.mrf.mxu0 }
 0x14c   : > { %v1139_v55 = vpack.c.bf16 %v1131_v53, %v1131_v53 }
 0x14d   : > { %v1022_v59 = vpop.f32.mrf.mxu2 }
 0x14e   : > { %1148 = vst.msk [vmem:[%s1725_s10 + $0x10] sm:$0xf] %vm1143_vm11, %v1139_v55  ;;  %v1035_v60 = vadd.f32 %v1022_v59, %v986_v57  ;;  %v976_v1 = vpop.f32.mrf.mxu1 }
 0x14f   : > { %v1070_v40 = vpop.f32.mrf.mxu3  ;;  %v987_v4 = vadd.f32 %v976_v1, %v938_v27 }
 0x150   : > { %v1083_v30 = vadd.f32 %v1070_v40, %v1035_v60 }
 0x152   : > { %v1132_v56 = vadd.f32 %v1119_v58, %v1083_v30 }
 0x153   : > { %v1122_v11 = vpop.f32.mrf.mxu0 }
 0x154   : > { %v1140_v3 = vpack.c.bf16 %v1132_v56, %v1132_v56 }
 0x155   : > { %v1025_v5 = vpop.f32.mrf.mxu2 }
 0x156   : > { %1149 = vst.msk [vmem:[%s1725_s10 + $0x14] sm:$0xf] %vm1143_vm11, %v1140_v3  ;;  %v1036_v6 = vadd.f32 %v1025_v5, %v987_v4  ;;  %v978_v2 = vpop.f32.mrf.mxu1 }
 0x157   : > { %v1073_v7 = vpop.f32.mrf.mxu3  ;;  %v988_v16 = vadd.f32 %v978_v2, %v939_v39 }
 0x158   : > { %v1084_v12 = vadd.f32 %v1073_v7, %v1036_v6 }
 0x15a   : > { %v1133_v34 = vadd.f32 %v1122_v11, %v1084_v12 }
 0x15b   : > { %v1124_v8 = vpop.f32.mrf.mxu0 }
 0x15c   : > { %v1141_v14 = vpack.c.bf16 %v1133_v34, %v1133_v34 }
 0x15d   : > { %v1027_v32 = vpop.f32.mrf.mxu2 }
 0x15e   : > { %1150 = vst.msk [vmem:[%s1725_s10 + $0x18] sm:$0xf] %vm1143_vm11, %v1141_v14  ;;  %v1037_v36 = vadd.f32 %v1027_v32, %v988_v16 }
 0x15f   : > { %v1075_v37 = vpop.f32.mrf.mxu3 }
 0x160   : > { %v1085_v62 = vadd.f32 %v1075_v37, %v1037_v36 }
 0x162   : > { %v1134_v15 = vadd.f32 %v1124_v8, %v1085_v62  ;;  %1154 = sbr.rel (%p1395_p9) target bundleno = 361 (0x169), region = 132 }
 0x164   : > { %v1142_v18 = vpack.c.bf16 %v1134_v15, %v1134_v15 }
 0x166   : > { %1151 = vst.msk [vmem:[%s1725_s10 + $0x1c] sm:$0xf] %vm1143_vm11, %v1142_v18 }
 0x167   : > { %vm1155_vm12 = vcmask 123904   ;;  %v1628_v13 = vmov 0.0  }
 0x168   : > { %1156 = vst.msk [vmem:[%s1715_s20] sm:$0x3] %vm1155_vm12, %v1628_v13 }
 0x169 PF: > { %v1158_v38 = vsel %vm700_vm2, %v1969_v52, 0.0  ;;  %v1159_v43 = vsel %vm700_vm2, %v1976_v42, 0.0  ;;  %v1161_v22 = vsel %vm700_vm2, %v1983_v41, 0.0  ;;  %v1163_v9 = vsel %vm700_vm2, %v1994_v46, 0.0 }
 0x16a   : > { %v1160_v44 = vadd.f32 %v1159_v43, %v1158_v38  ;;  %v1179_v45 = vmul.f32 %v1969_v52, %v1969_v52  ;;  %v1180_v20 = vmul.f32 %v1976_v42, %v1976_v42  ;;  %v1181_v10 = vmul.f32 %v1983_v41, %v1983_v41 }
 0x16b   : > { %v1182_v19 = vmul.f32 %v1994_v46, %v1994_v46  ;;  %v1165_v23 = vsel %vm700_vm2, %v1131_v53, 0.0  ;;  %v1183_v17 = vmul.f32 %v1131_v53, %v1131_v53  ;;  %v1167_v42 = vsel %vm700_vm2, %v1132_v56, 0.0 }
 0x16c   : > { %v1162_v61 = vadd.f32 %v1161_v22, %v1160_v44  ;;  %v1187_v28 = vsel %vm700_vm2, %v1179_v45, 0.0  ;;  %v1188_v47 = vsel %vm700_vm2, %v1180_v20, 0.0  ;;  %v1190_v52 = vsel %vm700_vm2, %v1181_v10, 0.0 }
 0x16d   : > { %v1189_v49 = vadd.f32 %v1188_v47, %v1187_v28  ;;  %v1184_v25 = vmul.f32 %v1132_v56, %v1132_v56  ;;  %v1192_v41 = vsel %vm700_vm2, %v1182_v19, 0.0  ;;  %v1169_v46 = vsel %vm700_vm2, %v1133_v34, 0.0 }
 0x16e   : > { %v1164_v48 = vadd.f32 %v1163_v9, %v1162_v61  ;;  %v1185_v0 = vmul.f32 %v1133_v34, %v1133_v34  ;;  %v1194_v24 = vsel %vm700_vm2, %v1183_v17, 0.0  ;;  %v1171_v21 = vsel %vm700_vm2, %v1134_v15, 0.0 }
 0x16f   : > { %v1191_v51 = vadd.f32 %v1190_v52, %v1189_v49  ;;  %v1186_v53 = vmul.f32 %v1134_v15, %v1134_v15  ;;  %v1196_v54 = vsel %vm700_vm2, %v1184_v25, 0.0  ;;  %v1157_v11 = vld [vmem:[%s1715_s20] sm:$0x3]  ;;  %vm1211_vm13 = vcmask 123904  }
 0x170   : > { %v1166_v50 = vadd.f32 %v1165_v23, %v1164_v48  ;;  %v1198_v58 = vsel %vm700_vm2, %v1185_v0, 0.0 }
 0x171   : > { %v1193_v26 = vadd.f32 %v1192_v41, %v1191_v51  ;;  %v1200_v60 = vsel %vm700_vm2, %v1186_v53, 0.0 }
 0x172   : > { %v1168_v29 = vadd.f32 %v1167_v42, %v1166_v50 }
 0x173   : > { %v1195_v57 = vadd.f32 %v1194_v24, %v1193_v26 }
 0x174   : > { %v1170_v55 = vadd.f32 %v1169_v46, %v1168_v29 }
 0x175   : > { %v1197_v31 = vadd.f32 %v1196_v54, %v1195_v57 }
 0x176   : > { %v1172_v59 = vadd.f32 %v1171_v21, %v1170_v55 }
 0x177   : > { %v1199_v1 = vadd.f32 %v1198_v58, %v1197_v31 }
 0x178   : > { %v1173_v40 = vrot.slane %v1172_v59, 4 }
 0x179   : > { %v1201_v30 = vadd.f32 %v1200_v60, %v1199_v1 }
 0x17a   : > { %v1174_v63 = vadd.f32 %v1173_v40, %v1172_v59 }
 0x17b   : > { %v1202_v56 = vrot.slane %v1201_v30, 4 }
 0x17c   : > { %v1175_v33 = vrot.slane %v1174_v63, 2 }
 0x17d   : > { %v1203_v3 = vadd.f32 %v1202_v56, %v1201_v30 }
 0x17e   : > { %v1176_v27 = vadd.f32 %v1175_v33, %v1174_v63 }
 0x17f   : > { %v1204_v5 = vrot.slane %v1203_v3, 2 }
 0x180   : > { %v1177_v4 = vrot.slane %v1176_v27, 1 }
 0x181   : > { %v1205_v35 = vadd.f32 %v1204_v5, %v1203_v3 }
 0x182   : > { %v1178_v6 = vadd.f32 %v1177_v4, %v1176_v27 }
 0x183   : > { %v1206_v7 = vrot.slane %v1205_v35, 1 }
 0x185   : > { %v1207_v12 = vadd.f32 %v1206_v7, %v1205_v35 }
 0x187   : > { %v1209_v2 = vsel %vm653_vm4, %v1178_v6, %v1207_v12 }
 0x188   : > { %v1210_v34 = vadd.f32 %v1209_v2, %v1157_v11 }
 0x18a   : > { %1212 = vst.msk [vmem:[%s1715_s20] sm:$0x3] %vm1211_vm13, %v1210_v34 }
 0x18b PF: > { %s19_s9 = sadd.s32 1, %s1624_s9   ;;  %s2085_s10 = sld [smem:[#allocation8_spill]] }
 0x18c   : > { %p16_p13 = scmp.ge.s32.totalorder %s19_s9, 10   ;;  %s2086_s24 = sld [smem:[#allocation9_spill]] }
 0x18d   : > { %s2087_s27 = smov %s1616_s29  ;;  %s2088_s28 = smov %s1620_s30 }
 0x18e   :  { %18 = sbr.rel (!%p16_p13) target bundleno = 3 (0x3), region = 196 }
 0x191   : > { %s2089_s29 = smov %s2085_s10 }
 0x192   : > { %s2090_s30 = smov %s2086_s24 }
 0x193   :  { %1259 = vsyncmov [#allocation3] }
 0x196   :  { %s1260_s20 = vpop.sfrf %1259 }
 0x197   :  { %p1493_p0 = scmp.ne.s32.totalorder %s1260_s20, 0 }
 0x199   :  { %1264 = shalt.err (%p1493_p0)  }
 0x19a   :  { %1266 = vsyncmov [#allocation3 + $0x1] }
 0x19d   :  { %s1267_s26 = vpop.sfrf %1266 }
 0x19e   :  { %p1494_p1 = scmp.ne.s32.totalorder %s1267_s26, 0 }
 0x1a0   :  { %1271 = shalt.err (%p1494_p1)  }

</bundles_post_ra>
